<compile_context>
chip_gen: v6e
topology: v6e:2x2x1
jax: 0.10.0
libtpu: 0.0.40
codegen_flags: <defaults>
</compile_context>

<pallas_src>
import functools

import jax
import jax.numpy as jnp
from jax.experimental import pallas as pl
from jax.experimental.pallas import tpu as pltpu


def _round_up(n, m):
    return ((n + m - 1) // m) * m


def _auto_vmem_limit():
    """Per-chip VMEM limit with headroom (~85% of physical, capped at 112 MiB)."""
    try:
        phys = int(pltpu.get_tpu_info().vmem_capacity_bytes)
    except Exception:
        phys = 64 * 1024 * 1024          # conservative fallback (v7x per-TC)
    return max(32 * 1024 * 1024, min(int(phys * 0.85), 112 * 1024 * 1024))


def _coupling_kernel(x_ref, w1_ref, w2_ref, w3_ref, b_ref, out_ref, *,
                     reverse: bool, hp: int, cdim: int):
    """out = x +/- (relu(relu(x@W1f+b1)@W2f+b2) @ W3f + b3f).

    W1f/W3f/b3f already encode the even/odd interleave (and optional lane
    packing), so the body is three lane-dense MXU matmuls plus VPU work.
    """
    x = x_ref[...]                                   # (bs, C_eff), input dtype
    xc = x.astype(w1_ref.dtype)                      # bf16 (or f32) for MXU

    b1 = b_ref[0:1, :hp]                             # f32 biases (packed slab)
    b2 = b_ref[1:2, :hp]
    b3 = b_ref[2:3, :cdim]

    h = jnp.dot(xc, w1_ref[...], preferred_element_type=jnp.float32)
    h = jnp.maximum(h + b1, 0.0)                     # f32 bias + ReLU

    h = jnp.dot(h.astype(w2_ref.dtype), w2_ref[...],
                preferred_element_type=jnp.float32)
    h = jnp.maximum(h + b2, 0.0)

    shift = jnp.dot(h.astype(w3_ref.dtype), w3_ref[...],
                    preferred_element_type=jnp.float32) + b3

    xf = x.astype(jnp.float32)
    res = xf - shift if reverse else xf + shift
    out_ref[...] = res.astype(out_ref.dtype)         # explicit cast on store


def _build_fused_params(params, C, *, mask, hid_round):
    """Fold the even/odd interleave + hidden-dim padding into f32 weights."""
    H = params["w1"].shape[0]
    D = C // 2
    assert params["w1"].shape == (H, D)
    Hp = _round_up(H, hid_round)

    in_off = 0 if mask else 1      # lanes holding x1 (the MLP input)
    out_off = 1 if mask else 0     # lanes holding x2 (receive the shift)

    w1f = jnp.zeros((C, Hp), jnp.float32).at[in_off::2, :H].set(params["w1"].T)
    b1f = jnp.zeros((Hp,), jnp.float32).at[:H].set(params["b1"])
    w2f = jnp.zeros((Hp, Hp), jnp.float32).at[:H, :H].set(params["w2"].T)
    b2f = jnp.zeros((Hp,), jnp.float32).at[:H].set(params["b2"])
    w3f = jnp.zeros((Hp, C), jnp.float32).at[:H, out_off::2].set(params["w3"].T)
    b3f = jnp.zeros((C,), jnp.float32).at[out_off::2].set(params["b3"])
    return w1f, b1f, w2f, b2f, w3f, b3f, Hp


def _block_diag(block, p):
    if p == 1:
        return block
    r, c = block.shape
    out = jnp.zeros((p * r, p * c), block.dtype)
    for i in range(p):
        out = out.at[i * r:(i + 1) * r, i * c:(i + 1) * c].set(block)
    return out


def coupling_layer_forward(x, params, *, mask=False, reverse=False,
                           block_bs=None, compute_dtype=jnp.bfloat16,
                           hid_round=128, single_buffer_weights=True,
                           vmem_limit_bytes=None, pack_lanes=None):
    """Pallas implementation of CouplingLayer.forward (layer_num=3 MLP).

    Note: on v6e/v7x (256-wide MXU) hid_round=256 can help when MXU-bound with
    large H; keep 128 (optimal on v5e, neutral when mem-bound) by default.
    """
    BS, C = x.shape

    if vmem_limit_bytes is None:
        vmem_limit_bytes = _auto_vmem_limit()

    w1f, b1f, w2f, b2f, w3f, b3f, Hp = _build_fused_params(
        params, C, mask=mask, hid_round=hid_round)

    # --- Lane-dense packing -------------------------------------------------
    # With C < 128 the output stores would be masked half-lane vst.msk and
    # matmuls 1/3 would run with K/N = C.  Fold P = 128 // C consecutive batch
    # rows into one 128-lane row with block-diagonal fused weights.
    cd_size = jnp.dtype(compute_dtype).itemsize
    if pack_lanes is None:
        pack_lanes = (C < 128) and (128 % C == 0) and (BS % (128 // C) == 0)
    P = (128 // C) if pack_lanes else 1
    if P > 1 and ((P * Hp) ** 2) * cd_size > vmem_limit_bytes // 3:
        P = 1                       # block-diagonal W2 too big; stay unpacked
    if P > 1:
        w1f = _block_diag(w1f, P)
        w2f = _block_diag(w2f, P)
        w3f = _block_diag(w3f, P)
        b1f = jnp.tile(b1f, P)
        b2f = jnp.tile(b2f, P)
        b3f = jnp.tile(b3f, P)
        x_in = x.reshape(BS // P, P * C)
    else:
        x_in = x
    BS_eff, C_eff = x_in.shape
    Hp_eff = P * Hp

    w1c = w1f.astype(compute_dtype)
    w2c = w2f.astype(compute_dtype)
    w3c = w3f.astype(compute_dtype)

    # Pack the three small f32 biases into one (8, Wmax) slab: one DMA and one
    # (8,128)-granule VMEM buffer instead of three.
    Wmax = _round_up(max(Hp_eff, C_eff), 128)
    bias = jnp.zeros((8, Wmax), jnp.float32)
    bias = bias.at[0, :Hp_eff].set(b1f)
    bias = bias.at[1, :Hp_eff].set(b2f)
    bias = bias.at[2, :C_eff].set(b3f)

    weight_bytes = (w1c.size + w2c.size + w3c.size) * cd_size + bias.size * 4
    weight_vmem = weight_bytes if single_buffer_weights else 2 * weight_bytes

    # --- Batch tiling from an explicit VMEM budget --------------------------
    itemsize = jnp.dtype(x.dtype).itemsize
    if block_bs is None:
        per_row = (4 * C_eff * itemsize        # x + out tiles, double-buffered
                   + 14 * Hp_eff               # f32 h (x2) + bf16 cast copies
                   + 12 * C_eff)               # f32 x, shift, result
        avail = vmem_limit_bytes - weight_vmem - (4 << 20)   # scratch headroom
        cap = (avail // per_row) if avail > per_row * 16 else 16
        cap = max(16, min(1024, int(cap)))
        cap = max(16, (cap // 16) * 16)
        # >= 2 grid steps (4 preferred, even count) so the x/out DMAs pipeline
        # and v7x's second TensorCore gets work.
        want_steps = 4 if BS_eff >= 64 else 2
        block_bs = min(cap, max(16, _round_up(pl.cdiv(BS_eff, want_steps), 16)))
    block_bs = min(block_bs, BS_eff)
    if BS_eff >= 16:
        block_bs = max(16, (block_bs // 16) * 16)
    grid = (pl.cdiv(BS_eff, block_bs),)

    kernel = functools.partial(_coupling_kernel, reverse=reverse,
                               hp=Hp_eff, cdim=C_eff)

    cost = pl.CostEstimate(
        flops=2 * BS_eff * (C_eff * Hp_eff + Hp_eff * Hp_eff + Hp_eff * C_eff),
        transcendentals=0,
        bytes_accessed=2 * BS * C * itemsize + weight_bytes)

    def _call(buffered_weights):
        def w_spec(shape):
            if buffered_weights:
                # Grid-invariant operands: double-buffering only wastes VMEM.
                return pl.BlockSpec(shape, lambda i: (0,) * len(shape),
                                    pipeline_mode=pl.Buffered(1))
            return pl.BlockSpec(shape, lambda i: (0,) * len(shape))

        return pl.pallas_call(
            kernel,
            out_shape=jax.ShapeDtypeStruct((BS_eff, C_eff), x.dtype),
            grid_spec=pltpu.PrefetchScalarGridSpec(
                num_scalar_prefetch=0,
                grid=grid,
                in_specs=[
                    pl.BlockSpec((block_bs, C_eff), lambda i: (i, 0)),  # x
                    w_spec((C_eff, Hp_eff)),                            # W1 fused
                    w_spec((Hp_eff, Hp_eff)),                           # W2
                    w_spec((Hp_eff, C_eff)),                            # W3 fused
                    w_spec((8, Wmax)),                                  # biases
                ],
                out_specs=pl.BlockSpec((block_bs, C_eff), lambda i: (i, 0)),
            ),
            compiler_params=pltpu.CompilerParams(
                dimension_semantics=("parallel",),
                vmem_limit_bytes=vmem_limit_bytes),
            cost_estimate=cost,
        )(x_in, w1c, w2c, w3c, bias)

    try:
        out = _call(single_buffer_weights)
    except Exception:
        if not single_buffer_weights:
            raise
        # pl.Buffered(1) unsupported in this build: use default pipelining.
        out = _call(False)

    if P > 1:
        out = out.reshape(BS, C)
    return out


def _reference_forward(x, params, *, mask=False, reverse=False):
    """Pure-JAX f32 reference mirroring the PyTorch module exactly."""
    BS, C = x.shape
    D = C // 2
    xr = x.reshape(BS, D, 2)
    if mask:
        x1, x2 = xr[:, :, 0], xr[:, :, 1]
    else:
        x1, x2 = xr[:, :, 1], xr[:, :, 0]
    h = jnp.maximum(x1 @ params["w1"].T + params["b1"], 0.0)
    h = jnp.maximum(h @ params["w2"].T + params["b2"], 0.0)
    shift = h @ params["w3"].T + params["b3"]
    out2 = x2 - shift if reverse else x2 + shift
    if mask:
        return jnp.stack([x1, out2], axis=2).reshape(BS, C)
    return jnp.stack([out2, x1], axis=2).reshape(BS, C)


def init_params(key, in_dim, hid_dim):
    """Deterministic torch.nn.Linear-shaped params (out, in)."""
    D = in_dim // 2
    ks = jax.random.split(key, 6)
    scale = 0.1
    return {
        "w1": scale * jax.random.normal(ks[0], (hid_dim, D), jnp.float32),
        "b1": scale * jax.random.normal(ks[1], (hid_dim,), jnp.float32),
        "w2": scale * jax.random.normal(ks[2], (hid_dim, hid_dim), jnp.float32),
        "b2": scale * jax.random.normal(ks[3], (hid_dim,), jnp.float32),
        "w3": scale * jax.random.normal(ks[4], (D, hid_dim), jnp.float32),
        "b3": scale * jax.random.normal(ks[5], (D,), jnp.float32),
    }


if __name__ == "__main__":
    key = jax.random.PRNGKey(0)
    k_x, k_p, k_x2, k_p2, k_x3 = jax.random.split(key, 5)

    # Case A: C=64 exercises lane-packing (P=2, fully dense 128-lane stores),
    # H=96 exercises the pad-to-128 path, BS=256 -> 4 pipelined grid steps.
    BS, in_dim, hid_dim = 256, 64, 96
    x = jax.random.normal(k_x, (BS, in_dim), jnp.float32)
    params = init_params(k_p, in_dim, hid_dim)
    ref = _reference_forward(x, params, mask=False, reverse=False)

    # 1) f32 compute path: validates the fused/packed restructuring exactly.
    out_f32 = jax.block_until_ready(coupling_layer_forward(
        x, params, compute_dtype=jnp.float32))
    assert out_f32.shape == (BS, in_dim)
    assert jnp.allclose(out_f32, ref, atol=1e-4, rtol=1e-4)

    # 2) Default bf16 fast path.
    out_bf16 = jax.block_until_ready(coupling_layer_forward(x, params))
    assert jnp.allclose(out_bf16, ref, atol=5e-2, rtol=5e-2)
    # Pass-through half is bit-exact (its shift is exactly zero).
    assert jnp.array_equal(out_bf16[:, 1::2], x[:, 1::2])

    # 3) reverse=True path.
    out_rev = jax.block_until_ready(coupling_layer_forward(
        x, params, reverse=True))
    assert jnp.allclose(out_rev,
                        _reference_forward(x, params, reverse=True),
                        atol=5e-2, rtol=5e-2)

    # 4) mask=True path.
    out_m = jax.block_until_ready(coupling_layer_forward(x, params, mask=True))
    assert jnp.allclose(out_m, _reference_forward(x, params, mask=True),
                        atol=5e-2, rtol=5e-2)
    assert jnp.array_equal(out_m[:, 0::2], x[:, 0::2])

    # 5) Batch not divisible by the block -> masked partial last block.
    BS_b = 200
    x_b = jax.random.normal(k_x2, (BS_b, in_dim), jnp.float32)
    out_b = jax.block_until_ready(coupling_layer_forward(
        x_b, params, compute_dtype=jnp.float32))
    assert jnp.allclose(out_b, _reference_forward(x_b, params),
                        atol=1e-4, rtol=1e-4)

    # 6) C=128 (already lane-dense) -> unpacked path.
    BS_c, in_dim_c, hid_c = 64, 128, 64
    x_c = jax.random.normal(k_x3, (BS_c, in_dim_c), jnp.float32)
    params_c = init_params(k_p2, in_dim_c, hid_c)
    out_c = jax.block_until_ready(coupling_layer_forward(
        x_c, params_c, compute_dtype=jnp.float32))
    assert jnp.allclose(out_c, _reference_forward(x_c, params_c),
                        atol=1e-4, rtol=1e-4)

    print("KERNEL_OK")
</pallas_src>

<mosaic_0001>
module attributes {stable_mosaic.version = 11 : i64} {
  func.func @_coupling_kernel(%arg0: i32, %arg1: memref<32x128xf32, #tpu.memory_space<vmem>>, %arg2: memref<128x256xf32, #tpu.memory_space<vmem>>, %arg3: memref<256x256xf32, #tpu.memory_space<vmem>>, %arg4: memref<256x128xf32, #tpu.memory_space<vmem>>, %arg5: memref<8x256xf32, #tpu.memory_space<vmem>>, %arg6: memref<32x128xf32, #tpu.memory_space<vmem>>) attributes {dimension_semantics = [#tpu.dimension_semantics<parallel>], iteration_bounds = array<i64: 4>, scalar_prefetch = 0 : i64, scratch_operands = 0 : i64, tpu.core_type = #tpu.core_type<tc>, window_params = [{transform_indices = @transform_0, window_bounds = array<i64: 32, 128>}, {pipeline_mode = #tpu.pipeline_mode<synchronous>, transform_indices = @transform_1, window_bounds = array<i64: 128, 256>}, {pipeline_mode = #tpu.pipeline_mode<synchronous>, transform_indices = @transform_2, window_bounds = array<i64: 256, 256>}, {pipeline_mode = #tpu.pipeline_mode<synchronous>, transform_indices = @transform_3, window_bounds = array<i64: 256, 128>}, {pipeline_mode = #tpu.pipeline_mode<synchronous>, transform_indices = @transform_4, window_bounds = array<i64: 8, 256>}, {transform_indices = @transform_5, window_bounds = array<i64: 32, 128>}]} {
    %c0 = arith.constant 0 : index
    %c0_0 = arith.constant 0 : index
    %0 = vector.load %arg1[%c0, %c0_0] : memref<32x128xf32, #tpu.memory_space<vmem>>, vector<32x128xf32>
    %c0_1 = arith.constant 0 : index
    %c0_2 = arith.constant 0 : index
    %1 = vector.load %arg5[%c0_1, %c0_2] : memref<8x256xf32, #tpu.memory_space<vmem>>, vector<1x256xf32>
    %c1 = arith.constant 1 : index
    %c0_3 = arith.constant 0 : index
    %2 = vector.load %arg5[%c1, %c0_3] : memref<8x256xf32, #tpu.memory_space<vmem>>, vector<1x256xf32>
    %c2 = arith.constant 2 : index
    %c0_4 = arith.constant 0 : index
    %3 = vector.load %arg5[%c2, %c0_4] : memref<8x256xf32, #tpu.memory_space<vmem>>, vector<1x128xf32>
    %c0_5 = arith.constant 0 : index
    %c0_6 = arith.constant 0 : index
    %4 = vector.load %arg2[%c0_5, %c0_6] : memref<128x256xf32, #tpu.memory_space<vmem>>, vector<128x256xf32>
    %cst = arith.constant dense<0.000000e+00> : vector<32x256xf32>
    %5 = tpu.matmul %0, %4, %cst {dimension_numbers = #tpu.dot_dimension_numbers<[1], [0], [0], [1], [0, 0, 1, 1], [], []>} : vector<32x128xf32>, vector<128x256xf32>, vector<32x256xf32> -> vector<32x256xf32>
    %6 = vector.broadcast %1 : vector<1x256xf32> to vector<32x256xf32>
    %7 = arith.addf %5, %6 : vector<32x256xf32>
    %cst_7 = arith.constant 0.000000e+00 : f32
    %8 = vector.broadcast %cst_7 : f32 to vector<32x256xf32>
    %9 = arith.maximumf %7, %8 : vector<32x256xf32>
    %c0_8 = arith.constant 0 : index
    %c0_9 = arith.constant 0 : index
    %10 = vector.load %arg3[%c0_8, %c0_9] : memref<256x256xf32, #tpu.memory_space<vmem>>, vector<256x256xf32>
    %cst_10 = arith.constant dense<0.000000e+00> : vector<32x256xf32>
    %11 = tpu.matmul %9, %10, %cst_10 {dimension_numbers = #tpu.dot_dimension_numbers<[1], [0], [0], [1], [0, 0, 1, 1], [], []>} : vector<32x256xf32>, vector<256x256xf32>, vector<32x256xf32> -> vector<32x256xf32>
    %12 = vector.broadcast %2 : vector<1x256xf32> to vector<32x256xf32>
    %13 = arith.addf %11, %12 : vector<32x256xf32>
    %cst_11 = arith.constant 0.000000e+00 : f32
    %14 = vector.broadcast %cst_11 : f32 to vector<32x256xf32>
    %15 = arith.maximumf %13, %14 : vector<32x256xf32>
    %c0_12 = arith.constant 0 : index
    %c0_13 = arith.constant 0 : index
    %16 = vector.load %arg4[%c0_12, %c0_13] : memref<256x128xf32, #tpu.memory_space<vmem>>, vector<256x128xf32>
    %cst_14 = arith.constant dense<0.000000e+00> : vector<32x128xf32>
    %17 = tpu.matmul %15, %16, %cst_14 {dimension_numbers = #tpu.dot_dimension_numbers<[1], [0], [0], [1], [0, 0, 1, 1], [], []>} : vector<32x256xf32>, vector<256x128xf32>, vector<32x128xf32> -> vector<32x128xf32>
    %18 = vector.broadcast %3 : vector<1x128xf32> to vector<32x128xf32>
    %19 = arith.addf %17, %18 : vector<32x128xf32>
    %20 = arith.addf %0, %19 : vector<32x128xf32>
    %c0_15 = arith.constant 0 : index
    %c0_16 = arith.constant 0 : index
    %21 = vector.load %arg6[%c0_15, %c0_16] : memref<32x128xf32, #tpu.memory_space<vmem>>, vector<32x128xf32>
    tpu.vector_store %arg6[%c0_15, %c0_16], %20 {strides = array<i32>} : memref<32x128xf32, #tpu.memory_space<vmem>>, vector<32x128xf32>,
    return
  }
  func.func @transform_0(%arg0: i32) -> (i32, i32) {
    %c0_i32 = arith.constant 0 : i32
    %c0_i32_0 = arith.constant 0 : i32
    return %arg0, %c0_i32 : i32, i32
  }
  func.func @transform_1(%arg0: i32) -> (i32, i32) {
    %c0_i32 = arith.constant 0 : i32
    %c0_i32_0 = arith.constant 0 : i32
    %c0_i32_1 = arith.constant 0 : i32
    return %c0_i32, %c0_i32_0 : i32, i32
  }
  func.func @transform_2(%arg0: i32) -> (i32, i32) {
    %c0_i32 = arith.constant 0 : i32
    %c0_i32_0 = arith.constant 0 : i32
    %c0_i32_1 = arith.constant 0 : i32
    return %c0_i32, %c0_i32_0 : i32, i32
  }
  func.func @transform_3(%arg0: i32) -> (i32, i32) {
    %c0_i32 = arith.constant 0 : i32
    %c0_i32_0 = arith.constant 0 : i32
    %c0_i32_1 = arith.constant 0 : i32
    return %c0_i32, %c0_i32_0 : i32, i32
  }
  func.func @transform_4(%arg0: i32) -> (i32, i32) {
    %c0_i32 = arith.constant 0 : i32
    %c0_i32_0 = arith.constant 0 : i32
    %c0_i32_1 = arith.constant 0 : i32
    return %c0_i32, %c0_i32_0 : i32, i32
  }
  func.func @transform_5(%arg0: i32) -> (i32, i32) {
    %c0_i32 = arith.constant 0 : i32
    %c0_i32_0 = arith.constant 0 : i32
    return %arg0, %c0_i32 : i32, i32
  }
}

module attributes {stable_mosaic.version = 11 : i64} {
  func.func @_coupling_kernel(%arg0: i32, %arg1: memref<32x128xf32, #tpu.memory_space<vmem>>, %arg2: memref<128x256xf32, #tpu.memory_space<vmem>>, %arg3: memref<256x256xf32, #tpu.memory_space<vmem>>, %arg4: memref<256x128xf32, #tpu.memory_space<vmem>>, %arg5: memref<8x256xf32, #tpu.memory_space<vmem>>, %arg6: memref<32x128xf32, #tpu.memory_space<vmem>>) attributes {dimension_semantics = [#tpu.dimension_semantics<parallel>], iteration_bounds = array<i64: 4>, scalar_prefetch = 0 : i64, scratch_operands = 0 : i64, tpu.core_type = #tpu.core_type<tc>, window_params = [{transform_indices = @transform_0, window_bounds = array<i64: 32, 128>}, {pipeline_mode = #tpu.pipeline_mode<synchronous>, transform_indices = @transform_1, window_bounds = array<i64: 128, 256>}, {pipeline_mode = #tpu.pipeline_mode<synchronous>, transform_indices = @transform_2, window_bounds = array<i64: 256, 256>}, {pipeline_mode = #tpu.pipeline_mode<synchronous>, transform_indices = @transform_3, window_bounds = array<i64: 256, 128>}, {pipeline_mode = #tpu.pipeline_mode<synchronous>, transform_indices = @transform_4, window_bounds = array<i64: 8, 256>}, {transform_indices = @transform_5, window_bounds = array<i64: 32, 128>}]} {
    %c0 = arith.constant 0 : index
    %c0_0 = arith.constant 0 : index
    %0 = vector.load %arg1[%c0, %c0_0] : memref<32x128xf32, #tpu.memory_space<vmem>>, vector<32x128xf32>
    %c0_1 = arith.constant 0 : index
    %c0_2 = arith.constant 0 : index
    %1 = vector.load %arg5[%c0_1, %c0_2] : memref<8x256xf32, #tpu.memory_space<vmem>>, vector<1x256xf32>
    %c1 = arith.constant 1 : index
    %c0_3 = arith.constant 0 : index
    %2 = vector.load %arg5[%c1, %c0_3] : memref<8x256xf32, #tpu.memory_space<vmem>>, vector<1x256xf32>
    %c2 = arith.constant 2 : index
    %c0_4 = arith.constant 0 : index
    %3 = vector.load %arg5[%c2, %c0_4] : memref<8x256xf32, #tpu.memory_space<vmem>>, vector<1x128xf32>
    %c0_5 = arith.constant 0 : index
    %c0_6 = arith.constant 0 : index
    %4 = vector.load %arg2[%c0_5, %c0_6] : memref<128x256xf32, #tpu.memory_space<vmem>>, vector<128x256xf32>
    %cst = arith.constant dense<0.000000e+00> : vector<32x256xf32>
    %5 = tpu.matmul %0, %4, %cst {dimension_numbers = #tpu.dot_dimension_numbers<[1], [0], [0], [1], [0, 0, 1, 1], [], []>} : vector<32x128xf32>, vector<128x256xf32>, vector<32x256xf32> -> vector<32x256xf32>
    %6 = vector.broadcast %1 : vector<1x256xf32> to vector<32x256xf32>
    %7 = arith.addf %5, %6 : vector<32x256xf32>
    %cst_7 = arith.constant 0.000000e+00 : f32
    %8 = vector.broadcast %cst_7 : f32 to vector<32x256xf32>
    %9 = arith.maximumf %7, %8 : vector<32x256xf32>
    %c0_8 = arith.constant 0 : index
    %c0_9 = arith.constant 0 : index
    %10 = vector.load %arg3[%c0_8, %c0_9] : memref<256x256xf32, #tpu.memory_space<vmem>>, vector<256x256xf32>
    %cst_10 = arith.constant dense<0.000000e+00> : vector<32x256xf32>
    %11 = tpu.matmul %9, %10, %cst_10 {dimension_numbers = #tpu.dot_dimension_numbers<[1], [0], [0], [1], [0, 0, 1, 1], [], []>} : vector<32x256xf32>, vector<256x256xf32>, vector<32x256xf32> -> vector<32x256xf32>
    %12 = vector.broadcast %2 : vector<1x256xf32> to vector<32x256xf32>
    %13 = arith.addf %11, %12 : vector<32x256xf32>
    %cst_11 = arith.constant 0.000000e+00 : f32
    %14 = vector.broadcast %cst_11 : f32 to vector<32x256xf32>
    %15 = arith.maximumf %13, %14 : vector<32x256xf32>
    %c0_12 = arith.constant 0 : index
    %c0_13 = arith.constant 0 : index
    %16 = vector.load %arg4[%c0_12, %c0_13] : memref<256x128xf32, #tpu.memory_space<vmem>>, vector<256x128xf32>
    %cst_14 = arith.constant dense<0.000000e+00> : vector<32x128xf32>
    %17 = tpu.matmul %15, %16, %cst_14 {dimension_numbers = #tpu.dot_dimension_numbers<[1], [0], [0], [1], [0, 0, 1, 1], [], []>} : vector<32x256xf32>, vector<256x128xf32>, vector<32x128xf32> -> vector<32x128xf32>
    %18 = vector.broadcast %3 : vector<1x128xf32> to vector<32x128xf32>
    %19 = arith.addf %17, %18 : vector<32x128xf32>
    %20 = arith.addf %0, %19 : vector<32x128xf32>
    %c0_15 = arith.constant 0 : index
    %c0_16 = arith.constant 0 : index
    %21 = vector.load %arg6[%c0_15, %c0_16] : memref<32x128xf32, #tpu.memory_space<vmem>>, vector<32x128xf32>
    tpu.vector_store %arg6[%c0_15, %c0_16], %20 {strides = array<i32>} : memref<32x128xf32, #tpu.memory_space<vmem>>, vector<32x128xf32>,
    return
  }
  func.func @transform_0(%arg0: i32) -> (i32, i32) {
    %c0_i32 = arith.constant 0 : i32
    %c0_i32_0 = arith.constant 0 : i32
    return %arg0, %c0_i32 : i32, i32
  }
  func.func @transform_1(%arg0: i32) -> (i32, i32) {
    %c0_i32 = arith.constant 0 : i32
    %c0_i32_0 = arith.constant 0 : i32
    %c0_i32_1 = arith.constant 0 : i32
    return %c0_i32, %c0_i32_0 : i32, i32
  }
  func.func @transform_2(%arg0: i32) -> (i32, i32) {
    %c0_i32 = arith.constant 0 : i32
    %c0_i32_0 = arith.constant 0 : i32
    %c0_i32_1 = arith.constant 0 : i32
    return %c0_i32, %c0_i32_0 : i32, i32
  }
  func.func @transform_3(%arg0: i32) -> (i32, i32) {
    %c0_i32 = arith.constant 0 : i32
    %c0_i32_0 = arith.constant 0 : i32
    %c0_i32_1 = arith.constant 0 : i32
    return %c0_i32, %c0_i32_0 : i32, i32
  }
  func.func @transform_4(%arg0: i32) -> (i32, i32) {
    %c0_i32 = arith.constant 0 : i32
    %c0_i32_0 = arith.constant 0 : i32
    %c0_i32_1 = arith.constant 0 : i32
    return %c0_i32, %c0_i32_0 : i32, i32
  }
  func.func @transform_5(%arg0: i32) -> (i32, i32) {
    %c0_i32 = arith.constant 0 : i32
    %c0_i32_0 = arith.constant 0 : i32
    return %arg0, %c0_i32 : i32, i32
  }
}

</mosaic_0001>

<bundles_post_ra>
// kernel: tpu_custom_call.1
= control target key start
LH: loop header
LB: loop body
LE: loop exit
PB: predicated region body
PF: predicated region fallthrough
CT: control target
= control target key end

     0   :  { %10 = vsyncpa [#allocation3], 0  ;;  %s1530_s0 = inlined_call_operand.hbm [shape: f32[128,128], index: 0, kind: input, shape index: {}]   ;;  %s1531_s1 = inlined_call_operand.hbm [shape: f32[128,256], index: 1, kind: input, shape index: {}]   ;;  %s1532_s2 = inlined_call_operand.hbm [shape: f32[256,256], index: 2, kind: input, shape index: {}]   ;;  %s1533_s3 = inlined_call_operand.hbm [shape: f32[256,128], index: 3, kind: input, shape index: {}]   ;;  %s1534_s4 = inlined_call_operand.hbm [shape: f32[8,256], index: 4, kind: input, shape index: {}]   ;;  %s1535_s5 = inlined_call_operand.hbm [shape: f32[128,128], index: 5, kind: output, shape index: {}]  }
   0x1   :  { %12 = vsyncpa [#allocation3 + $0x1], 0 }
   0x2   :  { %13 = vsyncpa [#allocation6], 0 }
   0x3   :  { %14 = vsyncpa [#allocation9], 0 }
   0x4   :  { %15 = vsyncpa [#allocation4], 0 }
   0x5   :  { %17 = vsyncpa [#allocation4 + $0x1], 0  ;;  %s1282_s18 = smov 0   ;;  %s1284_s19 = smov 0  }
   0x6   :  { %s1286_s20 = smov 0   ;;  %s1288_s21 = smov 0  }
   0x7 LB: > { %s1303_s22 = sadd.s32 4294967295, %s1237_s21   ;;  %s871_s23 = sadd.s32 4294967294, %s1237_s21   ;;  %s1237_s21 = sphi %s1288_s21, %s1560_s21   ;;  %s1233_s20 = sphi %s1286_s20, %s1559_s20   ;;  %s1229_s19 = sphi %s1284_s19, %s1558_s19   ;;  %s1225_s18 = sphi %s1282_s18, %s1557_s18  }
   0x8   : > { %p43_p0 = scmp.ne.s32.totalorder %s1229_s19, %s1225_s18  ;;  %p1536_p1 = scmp.eq.s32.totalorder %s1303_s22, 0 }
   0x9   : > { %p157_p3 = scmp.eq.s32.totalorder %s871_s23, 3  ;;  %p872_p5 = scmp.ge.s32.totalorder %s1237_s21, 1 }
   0xa   : > { %p1312_p4 = por %p1536_p1, %p43_p0  ;;  %p164_p7 = scmp.lt.s32.totalorder %s1237_s21, 5 }
   0xb   : > { %p1317_p6 = por %p157_p3, %p43_p0  ;;  %s1239_s27 = smov [#allocation5]  }
   0xc   : > { %s1541_s24 = scalar_select %p1312_p4, 1, 0 }
   0xd   : > { %s1542_s25 = scalar_select %p1317_p6, 1, 0 }
   0xe   : > { %p1322_p8 = pnand %p872_p5, %p164_p7  ;;  %s176_s28 = sshll.u32 %s1239_s27, 4  ;;  %s177_s28 = int_to_ptr.vmem [resolvable:$true] %s176_s28 }
   0xf   : > { %s1240_s30 = smov [#allocation8]   ;;  %s1044_s7 = scalar_lea.vmem %s177_s28, 4096 }
  0x10   : > { %s1543_s26 = scalar_select %p1322_p8, 1, 0 }
  0x11   : > { %p959_p9 = pneg %p1322_p8  ;;  %s202_s6 = sshll.u32 %s1240_s30, 4  ;;  %s203_s6 = int_to_ptr.vmem [resolvable:$true] %s202_s6 }
  0x12   : > { %p1045_p12 = scmp.ne.s32.totalorder %s177_s28, %s1044_s7  ;;  %p1052_p3 = scmp.lt.s32.totalorder %s177_s28, %s177_s28 }
  0x13   : > { %p1330_p10 = pnand %p959_p9, %p1536_p1  ;;  %p1053_p5 = scmp.lt.s32.totalorder %s1044_s7, %s1044_s7 }
  0x15   : > { %p1035_p11 = pneg %p1330_p10  ;;  %p1054_p7 = por %p1053_p5, %p1052_p3 }
  0x17   : > { %p1047_p13 = pnand %p1045_p12, %p1035_p11 }
  0x19   : > { %p1048_p0 = pneg %p1047_p13 }
  0x1b   : > { %p1055_p9 = pnand %p1054_p7, %p1048_p0 }
  0x1d   : > { %1058 = shalt.err (!%p1055_p9)
}
  0x1e   : > { %s1241_s8 = smov 256   ;;  %s1242_s9 = smov 16  }
  0x1f   : > { %962 = dma.hbm_to_vmem [thread:$0]  (!%p1330_p10), %s1531_s1, 4096, %s177_s28, [#allocation6], %s1241_s8, %s1241_s8, %s1242_s9  }
  0x20   : > { %s1070_s12 = scalar_lea.vmem %s203_s6, 4096  ;;  %p1078_p0 = scmp.lt.s32.totalorder %s203_s6, %s203_s6 }
  0x21   : > { %p1071_p12 = scmp.ne.s32.totalorder %s203_s6, %s1070_s12  ;;  %p1079_p5 = scmp.lt.s32.totalorder %s1070_s12, %s1070_s12 }
  0x23   : > { %p1073_p13 = pnand %p1071_p12, %p1035_p11  ;;  %p1080_p7 = por %p1079_p5, %p1078_p0 }
  0x25   : > { %p1074_p3 = pneg %p1073_p13 }
  0x27   : > { %p1081_p9 = pnand %p1080_p7, %p1074_p3 }
  0x29   : > { %1084 = shalt.err (!%p1081_p9)
}
  0x2a   : > { %s1537_s13 = smov 128   ;;  %s1244_s14 = smov 8  }
  0x2b   : > { %968 = dma.hbm_to_vmem [thread:$0]  (!%p1330_p10), %s1533_s3, 4096, %s203_s6, [#allocation9], %s1537_s13, %s1537_s13, %s1244_s14  }
  0x2c   : > { %s1245_s17 = smov [#allocation7]   ;;  %s1246_s27 = smov [#allocation10]  }
  0x2d   : > { %s189_s23 = sshll.u32 %s1245_s17, 4  ;;  %s216_s28 = sshll.u32 %s1246_s27, 4  ;;  %s190_s23 = int_to_ptr.vmem [resolvable:$true] %s189_s23  ;;  %s217_s28 = int_to_ptr.vmem [resolvable:$true] %s216_s28 }
  0x2e   : > { %s1096_s30 = scalar_lea.vmem %s190_s23, 8192  ;;  %p1104_p0 = scmp.lt.s32.totalorder %s190_s23, %s190_s23 }
  0x2f   : > { %p1097_p12 = scmp.ne.s32.totalorder %s190_s23, %s1096_s30  ;;  %p1105_p5 = scmp.lt.s32.totalorder %s1096_s30, %s1096_s30 }
  0x31   : > { %p1099_p13 = pnand %p1097_p12, %p1035_p11  ;;  %p1106_p7 = por %p1105_p5, %p1104_p0 }
  0x33   : > { %p1100_p3 = pneg %p1099_p13 }
  0x35   : > { %p1107_p9 = pnand %p1106_p7, %p1100_p3 }
  0x37   : > { %1110 = shalt.err (!%p1107_p9)
}
  0x38   : > { %965 = dma.hbm_to_vmem [thread:$0]  (!%p1330_p10), %s1532_s2, 8192, %s190_s23, [#allocation6], %s1241_s8, %s1241_s8, %s1242_s9  }
  0x39   : > { %s1122_s10 = scalar_lea.vmem %s217_s28, 256  ;;  %p1130_p2 = scmp.lt.s32.totalorder %s217_s28, %s217_s28 }
  0x3a   : > { %p1123_p1 = scmp.ne.s32.totalorder %s217_s28, %s1122_s10  ;;  %p1131_p0 = scmp.lt.s32.totalorder %s1122_s10, %s1122_s10 }
  0x3c   : > { %p1125_p12 = pnand %p1123_p1, %p1035_p11  ;;  %p1132_p3 = por %p1131_p0, %p1130_p2 }
  0x3e   : > { %p1126_p13 = pneg %p1125_p12 }
  0x40   : > { %p1133_p5 = pnand %p1132_p3, %p1126_p13 }
  0x42   : > { %1136 = shalt.err (!%p1133_p5)
}
  0x43   : > { %971 = dma.hbm_to_vmem [thread:$0]  (!%p1330_p10), %s1534_s4, 256, %s217_s28, [#allocation9]  }
  0x44   : > { %s1378_s8 = sadd.s32 1, %s1237_s21   ;;  %s30_s29 = sadd.s32 1, %s1233_s20 }
  0x45   : > { %s27_s9 = ssub.s32 %s1237_s21, %s1378_s8  ;;  %p37_p2 = scmp.ne.s32.totalorder %s1233_s20, %s1229_s19 }
  0x46   : > { %p28_p1 = scmp.eq.s32.totalorder %s27_s9, 0  ;;  %p38_p11 = scmp.eq.s32.totalorder %s1237_s21, 0 }
  0x47   : > { %p1545_p9 = scmp.eq.s32.totalorder %s1303_s22, 3  ;;  %p984_p13 = scmp.lt.s32.totalorder %s1237_s21, 4 }
  0x48   : > { %s1387_s15 = scalar_select %p28_p1, %s1233_s20, %s30_s29  }
  0x49   : > { %p39_p7 = por %p38_p11, %p37_p2  ;;  %p1391_p12 = por %p1545_p9, %p37_p2 }
  0x4a   : > { %s227_s17 = sand.u32 1, %s1233_s20   ;;  %s893_s27 = sshll.u32 %s1237_s21, 9 }
  0x4b   : > { %s1546_s16 = scalar_select %p1391_p12, 1, 0 }
  0x4c   : > { %s878_s23 = sshll.u32 %s227_s17, 5  ;;  %s1401_s6 = scalar_lea.hbm %s1530_s0, %s893_s27 }
  0x4d   : > { %s231_s7 = scalar_lea.vmem [#allocation2], %s878_s23  ;;  %p1405_p10 = pnand %p984_p13, %p39_p7 }
  0x4e   : > { %s238_s10 = sshll.u32 %s231_s7, 4  ;;  %s1409_s12 = scalar_lea.sflag [#allocation3], %s227_s17  ;;  %s1403_s10 = int_to_ptr.vmem [resolvable:$true] %s238_s10 }
  0x4f   : > { %s1137_s9 = scalar_lea.hbm %s1401_s6, 512  ;;  %p1139_p3 = pneg %p1405_p10 }
  0x50   : > { %p1138_p0 = scmp.ne.s32.totalorder %s1401_s6, %s1137_s9  ;;  %s1142_s23 = scalar_lea.hbm %s1530_s0, 2048 }
  0x51   : > { %p1143_p2 = scmp.lt.s32.totalorder %s1401_s6, %s1530_s0  ;;  %p1144_p11 = scmp.lt.s32.totalorder %s1142_s23, %s1137_s9 }
  0x52   : > { %p1140_p5 = pnand %p1139_p3, %p1138_p0 }
  0x53   : > { %p1145_p7 = por %p1144_p11, %p1143_p2 }
  0x54   : > { %p1141_p1 = pneg %p1140_p5 }
  0x56   : > { %p1146_p9 = pnand %p1145_p7, %p1141_p1 }
  0x58   : > { %1149 = shalt.err (!%p1146_p9)
}
  0x59   : > { %s1150_s17 = scalar_lea.vmem %s1403_s10, 512  ;;  %s1247_s7 = smov [#allocation2]  }
  0x5a   : > { %p1151_p13 = scmp.ne.s32.totalorder %s1403_s10, %s1150_s17  ;;  %s1155_s13 = sshll.u32 %s1247_s7, 4  ;;  %s1156_s13 = int_to_ptr.vmem [resolvable:$false] %s1155_s13 }
  0x5b   : > { %s1157_s29 = scalar_lea.vmem %s1156_s13, 1024  ;;  %p1158_p5 = scmp.lt.s32.totalorder %s1403_s10, %s1156_s13 }
  0x5c   : > { %p1153_p6 = pnand %p1151_p13, %p1139_p3  ;;  %p1159_p12 = scmp.lt.s32.totalorder %s1157_s29, %s1150_s17 }
  0x5e   : > { %p1154_p0 = pneg %p1153_p6  ;;  %p1160_p4 = por %p1159_p12, %p1158_p5 }
  0x60   : > { %p1161_p8 = pnand %p1160_p4, %p1154_p0 }
  0x62   : > { %1164 = shalt.err (!%p1161_p8)
}
  0x63   : > { %s1548_s9 = smov 128   ;;  %p1549_p6 = scmp.ne.s32.totalorder %s1543_s26, 0 }
  0x64   : > { %975 = dma.hbm_to_vmem [thread:$0]  (!%p1405_p10), %s1401_s6, 512, %s1403_s10, %s1409_s12, %s1548_s9, %s1548_s9, %s1244_s14  }
  0x65   : > { %250 = sbr.rel (%p1549_p6) target bundleno = 773 (0x305), region = 40  ;;  %s1436_s27 = sand.u32 (!%p1549_p6), 1, %s1229_s19  }
  0x66   : > { %s882_s13 = sshll.u32 (!%p1549_p6), %s1436_s27, 5  ;;  %s253_s23 = scalar_lea.sflag (!%p1549_p6), [#allocation3], %s1436_s27 }
  0x67   : > { %s1442_s11 = scalar_lea.vmem (!%p1549_p6), [#allocation2], %s882_s13  ;;  %p1550_p4 = scmp.ne.s32.totalorder (!%p1549_p6), %s1541_s24, 0 }
  0x6a   : > { %1208 = dma.done.wait (%p1550_p4), %s253_s23, 512  }
  0x6b   : > { %1210 = vsyncadd (%p1550_p4), %s253_s23, 4294966784  ;;  %p1551_p8 = scmp.eq.s32.totalorder %s1303_s22, 0 }
  0x6d   : > { %1212 = dma.done.wait (%p1551_p8), [#allocation6], 12288   ;;  %p1552_p12 = pmov %p1551_p8 }
  0x6e   : > { %p1553_p10 = pmov %p1551_p8 }
  0x6f   : > { %1214 = vsyncadd (%p1552_p12), [#allocation6], 4294955008 }
  0x70   : > { %1216 = dma.done.wait (%p1553_p10), [#allocation9], 4352   ;;  %p1554_p3 = pmov %p1551_p8 }
  0x71   : > { %v1248_v0 = vmov 0.0   ;;  %v340_v1 = vld [vmem:[#allocation5 + $0xf8] sm:$0xff]  ;;  %v339_v2 = vld [vmem:[#allocation5 + $0xf0] sm:$0xff]  ;;  %v338_v3 = vld [vmem:[#allocation5 + $0xe8] sm:$0xff]  ;;  %s298_s24 = scalar_lea.vmem [#allocation11], %s882_s13  ;;  %s894_s14 = sshll.u32 %s1303_s22, 9 }
  0x72   : > { %1218 = vsyncadd (%p1554_p3), [#allocation9], 4294962944  ;;  %416 = vmatprep.mubr.f32.mxu0 %v1248_v0  ;;  %352 = vmatprep.subr.mxu0 %v340_v1  ;;  %v337_v4 = vld [vmem:[#allocation5 + $0xe0] sm:$0xff]  ;;  %v336_v5 = vld [vmem:[#allocation5 + $0xd8] sm:$0xff]  ;;  %s760_s26 = sshll.u32 %s298_s24, 4  ;;  %s1487_s12 = scalar_lea.hbm %s1535_s5, %s894_s14  ;;  %s1482_s26 = int_to_ptr.vmem [resolvable:$true] %s760_s26 }
  0x73   : > { %353 = vmatpush1.msra.mxu0 %v339_v2  ;;  %v335_v6 = vld [vmem:[#allocation5 + $0xd0] sm:$0xff]  ;;  %v334_v7 = vld [vmem:[#allocation5 + $0xc8] sm:$0xff]  ;;  %v333_v8 = vld [vmem:[#allocation5 + $0xc0] sm:$0xff]  ;;  %s747_s28 = scalar_lea.sflag [#allocation4], %s1436_s27  ;;  %s1165_s30 = scalar_lea.vmem %s1482_s26, 512 }
  0x74   : > { %354 = vmatprep.subr.mxu0 %v338_v3  ;;  %v332_v9 = vld [vmem:[#allocation5 + $0xb8] sm:$0xff]  ;;  %v331_v10 = vld [vmem:[#allocation5 + $0xb0] sm:$0xff]  ;;  %v330_v11 = vld [vmem:[#allocation5 + $0xa8] sm:$0xff]  ;;  %p1166_p1 = scmp.ne.s32.totalorder %s1482_s26, %s1165_s30  ;;  %p1555_p2 = scmp.ne.s32.totalorder %s1546_s16, 0 }
  0x75   : > { %355 = vmatpush1.msra.mxu0 %v337_v4  ;;  %v329_v12 = vld [vmem:[#allocation5 + $0xa0] sm:$0xff]  ;;  %v328_v13 = vld [vmem:[#allocation5 + $0x98] sm:$0xff]  ;;  %v327_v14 = vld [vmem:[#allocation5 + $0x90] sm:$0xff]  ;;  %s1249_s22 = smov [#allocation11]  }
  0x76   : > { %356 = vmatprep.subr.mxu0 %v336_v5  ;;  %v326_v15 = vld [vmem:[#allocation5 + $0x88] sm:$0xff]  ;;  %v480_v16 = vld [vmem:[#allocation7 + $0xf8] sm:$0xff]  ;;  %v479_v17 = vld [vmem:[#allocation7 + $0xf0] sm:$0xff]  ;;  %p1167_p11 = pnand %p1166_p1, %p1555_p2  ;;  %s1169_s17 = sshll.u32 %s1249_s22, 4  ;;  %s1170_s17 = int_to_ptr.vmem [resolvable:$false] %s1169_s17 }
  0x77   : > { %357 = vmatpush1.msra.mxu0 %v335_v6  ;;  %v478_v18 = vld [vmem:[#allocation7 + $0xe8] sm:$0xff]  ;;  %v325_v19 = vld [vmem:[#allocation5 + $0x80] sm:$0xff]  ;;  %524 = vmatprep.subr.mxu1 %v480_v16  ;;  %v324_v21 = vld [vmem:[#allocation5 + $0x78] sm:$0xff]  ;;  %s1171_s7 = scalar_lea.vmem %s1170_s17, 1024  ;;  %p1172_p9 = scmp.lt.s32.totalorder %s1482_s26, %s1170_s17 }
  0x78   : > { %358 = vmatprep.subr.mxu0 %v334_v7  ;;  %v477_v20 = vld [vmem:[#allocation7 + $0xe0] sm:$0xff]  ;;  %525 = vmatpush1.msra.mxu1 %v479_v17  ;;  %v476_v22 = vld [vmem:[#allocation7 + $0xd8] sm:$0xff]  ;;  %v323_v23 = vld [vmem:[#allocation5 + $0x70] sm:$0xff]  ;;  %p1168_p7 = pneg %p1167_p11  ;;  %p1173_p13 = scmp.lt.s32.totalorder %s1171_s7, %s1165_s30 }
  0x79   : > { %359 = vmatpush1.msra.mxu0 %v333_v8  ;;  %526 = vmatprep.subr.mxu1 %v478_v18  ;;  %v475_v24 = vld [vmem:[#allocation7 + $0xd0] sm:$0xff]  ;;  %v322_v25 = vld [vmem:[#allocation5 + $0x68] sm:$0xff]  ;;  %v321_v27 = vld [vmem:[#allocation5 + $0x60] sm:$0xff] }
  0x7a   : > { %360 = vmatprep.subr.mxu0 %v332_v9  ;;  %527 = vmatpush1.msra.mxu1 %v477_v20  ;;  %v474_v26 = vld [vmem:[#allocation7 + $0xc8] sm:$0xff]  ;;  %v473_v28 = vld [vmem:[#allocation7 + $0xc0] sm:$0xff]  ;;  %v320_v29 = vld [vmem:[#allocation5 + $0x58] sm:$0xff]  ;;  %p1174_p0 = por %p1173_p13, %p1172_p9 }
  0x7b   : > { %361 = vmatpush1.msra.mxu0 %v331_v10  ;;  %528 = vmatprep.subr.mxu1 %v476_v22  ;;  %v472_v30 = vld [vmem:[#allocation7 + $0xb8] sm:$0xff]  ;;  %v319_v31 = vld [vmem:[#allocation5 + $0x50] sm:$0xff]  ;;  %v318_v33 = vld [vmem:[#allocation5 + $0x48] sm:$0xff] }
  0x7c   : > { %362 = vmatprep.subr.mxu0 %v330_v11  ;;  %529 = vmatpush1.msra.mxu1 %v475_v24  ;;  %v471_v32 = vld [vmem:[#allocation7 + $0xb0] sm:$0xff]  ;;  %v470_v34 = vld [vmem:[#allocation7 + $0xa8] sm:$0xff]  ;;  %v317_v35 = vld [vmem:[#allocation5 + $0x40] sm:$0xff]  ;;  %p1175_p5 = pnand %p1174_p0, %p1168_p7 }
  0x7d   : > { %363 = vmatpush1.msra.mxu0 %v329_v12  ;;  %530 = vmatprep.subr.mxu1 %v474_v26  ;;  %v469_v36 = vld [vmem:[#allocation7 + $0xa0] sm:$0xff]  ;;  %v316_v37 = vld [vmem:[#allocation5 + $0x38] sm:$0xff]  ;;  %v315_v39 = vld [vmem:[#allocation5 + $0x30] sm:$0xff] }
  0x7e   : > { %364 = vmatprep.subr.mxu0 %v328_v13  ;;  %531 = vmatpush1.msra.mxu1 %v473_v28  ;;  %v468_v38 = vld [vmem:[#allocation7 + $0x98] sm:$0xff]  ;;  %v467_v40 = vld [vmem:[#allocation7 + $0x90] sm:$0xff]  ;;  %v314_v41 = vld [vmem:[#allocation5 + $0x28] sm:$0xff] }
  0x7f   : > { %365 = vmatpush1.msra.mxu0 %v327_v14  ;;  %532 = vmatprep.subr.mxu1 %v472_v30  ;;  %v466_v42 = vld [vmem:[#allocation7 + $0x88] sm:$0xff]  ;;  %v313_v43 = vld [vmem:[#allocation5 + $0x20] sm:$0xff]  ;;  %v312_v45 = vld [vmem:[#allocation5 + $0x18] sm:$0xff] }
  0x80   : > { %366 = vmatprep.subr.mxu0 %v326_v15  ;;  %533 = vmatpush1.msra.mxu1 %v471_v32  ;;  %v465_v44 = vld [vmem:[#allocation7 + $0x80] sm:$0xff]  ;;  %v464_v46 = vld [vmem:[#allocation7 + $0x78] sm:$0xff]  ;;  %v311_v47 = vld [vmem:[#allocation5 + $0x10] sm:$0xff] }
  0x81   : > { %367 = vmatpush1.msra.mxu0 %v325_v19  ;;  %534 = vmatprep.subr.mxu1 %v470_v34  ;;  %v463_v48 = vld [vmem:[#allocation7 + $0x70] sm:$0xff]  ;;  %v310_v49 = vld [vmem:[#allocation5 + $0x8] sm:$0xff]  ;;  %v309_v51 = vld [vmem:[#allocation5] sm:$0xff] }
  0x82   : > { %368 = vmatprep.subr.mxu0 %v324_v21  ;;  %535 = vmatpush1.msra.mxu1 %v469_v36  ;;  %v462_v50 = vld [vmem:[#allocation7 + $0x68] sm:$0xff]  ;;  %v461_v52 = vld [vmem:[#allocation7 + $0x60] sm:$0xff]  ;;  %v460_v54 = vld [vmem:[#allocation7 + $0x58] sm:$0xff] }
  0x83   : > { %369 = vmatpush1.msra.mxu0 %v323_v23  ;;  %536 = vmatprep.subr.mxu1 %v468_v38  ;;  %v1458_v53 = vld [vmem:[%s1442_s11] sm:$0xff]  ;;  %v459_v55 = vld [vmem:[#allocation7 + $0x50] sm:$0xff]  ;;  %v458_v56 = vld [vmem:[#allocation7 + $0x48] sm:$0xff] }
  0x84   : > { %370 = vmatprep.subr.mxu0 %v322_v25  ;;  %537 = vmatpush1.msra.mxu1 %v467_v40  ;;  %v457_v57 = vld [vmem:[#allocation7 + $0x40] sm:$0xff]  ;;  %v1463_v58 = vld [vmem:[%s1442_s11 + $0x8] sm:$0xff]  ;;  %v456_v59 = vld [vmem:[#allocation7 + $0x38] sm:$0xff] }
  0x85   : > { %371 = vmatpush1.msra.mxu0 %v321_v27  ;;  %538 = vmatprep.subr.mxu1 %v466_v42  ;;  %v455_v60 = vld [vmem:[#allocation7 + $0x30] sm:$0xff]  ;;  %v454_v61 = vld [vmem:[#allocation7 + $0x28] sm:$0xff]  ;;  %v453_v62 = vld [vmem:[#allocation7 + $0x20] sm:$0xff] }
  0x86   : > { %372 = vmatprep.subr.mxu0 %v320_v29  ;;  %539 = vmatpush1.msra.mxu1 %v465_v44  ;;  %v1468_v63 = vld [vmem:[%s1442_s11 + $0x10] sm:$0xff]  ;;  %v452_v1 = vld [vmem:[#allocation7 + $0x18] sm:$0xff]  ;;  %v450_v3 = vld [vmem:[#allocation7 + $0x8] sm:$0xff] }
  0x87   : > { %373 = vmatpush1.msra.mxu0 %v319_v31  ;;  %540 = vmatprep.subr.mxu1 %v464_v46  ;;  %v451_v2 = vld [vmem:[#allocation7 + $0x10] sm:$0xff]  ;;  %v449_v4 = vld [vmem:[#allocation7] sm:$0xff]  ;;  %v1473_v5 = vld [vmem:[%s1442_s11 + $0x18] sm:$0xff] }
  0x88   : > { %374 = vmatprep.subr.mxu0 %v318_v33  ;;  %541 = vmatpush1.msra.mxu1 %v463_v48  ;;  %v512_v6 = vld [vmem:[#allocation7 + $0x1f8] sm:$0xff]  ;;  %v511_v7 = vld [vmem:[#allocation7 + $0x1f0] sm:$0xff]  ;;  %v510_v8 = vld [vmem:[#allocation7 + $0x1e8] sm:$0xff] }
  0x89   : > { %375 = vmatpush1.msra.mxu0 %v317_v35  ;;  %542 = vmatprep.subr.mxu1 %v462_v50  ;;  %v509_v9 = vld [vmem:[#allocation7 + $0x1e0] sm:$0xff]  ;;  %v508_v10 = vld [vmem:[#allocation7 + $0x1d8] sm:$0xff]  ;;  %v507_v11 = vld [vmem:[#allocation7 + $0x1d0] sm:$0xff] }
  0x8a   : > { %376 = vmatprep.subr.mxu0 %v316_v37  ;;  %543 = vmatpush1.msra.mxu1 %v461_v52  ;;  %v506_v12 = vld [vmem:[#allocation7 + $0x1c8] sm:$0xff]  ;;  %v504_v13 = vld [vmem:[#allocation7 + $0x1b8] sm:$0xff]  ;;  %v503_v14 = vld [vmem:[#allocation7 + $0x1b0] sm:$0xff] }
  0x8b   : > { %377 = vmatpush1.msra.mxu0 %v315_v39  ;;  %544 = vmatprep.subr.mxu1 %v460_v54  ;;  %v502_v15 = vld [vmem:[#allocation7 + $0x1a8] sm:$0xff]  ;;  %v501_v16 = vld [vmem:[#allocation7 + $0x1a0] sm:$0xff]  ;;  %v500_v17 = vld [vmem:[#allocation7 + $0x198] sm:$0xff] }
  0x8c   : > { %378 = vmatprep.subr.mxu0 %v314_v41  ;;  %545 = vmatpush1.msra.mxu1 %v459_v55  ;;  %v499_v18 = vld [vmem:[#allocation7 + $0x190] sm:$0xff]  ;;  %v498_v19 = vld [vmem:[#allocation7 + $0x188] sm:$0xff]  ;;  %v497_v20 = vld [vmem:[#allocation7 + $0x180] sm:$0xff] }
  0x8d   : > { %379 = vmatpush1.msra.mxu0 %v313_v43  ;;  %546 = vmatprep.subr.mxu1 %v458_v56  ;;  %v496_v21 = vld [vmem:[#allocation7 + $0x178] sm:$0xff]  ;;  %v495_v22 = vld [vmem:[#allocation7 + $0x170] sm:$0xff]  ;;  %v494_v23 = vld [vmem:[#allocation7 + $0x168] sm:$0xff] }
  0x8e   : > { %380 = vmatprep.subr.mxu0 %v312_v45  ;;  %547 = vmatpush1.msra.mxu1 %v457_v57  ;;  %v493_v24 = vld [vmem:[#allocation7 + $0x160] sm:$0xff]  ;;  %v492_v25 = vld [vmem:[#allocation7 + $0x158] sm:$0xff]  ;;  %v491_v26 = vld [vmem:[#allocation7 + $0x150] sm:$0xff] }
  0x8f   : > { %381 = vmatpush1.msra.mxu0 %v311_v47  ;;  %548 = vmatprep.subr.mxu1 %v456_v59  ;;  %v490_v27 = vld [vmem:[#allocation7 + $0x148] sm:$0xff]  ;;  %v489_v28 = vld [vmem:[#allocation7 + $0x140] sm:$0xff]  ;;  %v488_v29 = vld [vmem:[#allocation7 + $0x138] sm:$0xff] }
  0x90   : > { %382 = vmatprep.subr.mxu0 %v310_v49  ;;  %549 = vmatpush1.msra.mxu1 %v455_v60  ;;  %v487_v30 = vld [vmem:[#allocation7 + $0x130] sm:$0xff]  ;;  %v486_v31 = vld [vmem:[#allocation7 + $0x128] sm:$0xff]  ;;  %v485_v32 = vld [vmem:[#allocation7 + $0x120] sm:$0xff] }
  0x91   : > { %383 = vmatpush1.msra.mxu0 %v309_v51  ;;  %550 = vmatprep.subr.mxu1 %v454_v61  ;;  %v484_v33 = vld [vmem:[#allocation7 + $0x118] sm:$0xff]  ;;  %v483_v34 = vld [vmem:[#allocation7 + $0x110] sm:$0xff]  ;;  %v482_v35 = vld [vmem:[#allocation7 + $0x108] sm:$0xff] }
  0x92   : > { %417 = vmatmul.mubr.f32.vlgmr.msra.gmra.mxu0 %v1458_v53  ;;  %551 = vmatpush1.msra.mxu1 %v453_v62  ;;  %v481_v36 = vld [vmem:[#allocation7 + $0x100] sm:$0xff]  ;;  %v652_v37 = vld [vmem:[#allocation8 + $0xf8] sm:$0xff]  ;;  %v651_v39 = vld [vmem:[#allocation8 + $0xf0] sm:$0xff] }
  0x93   : > { %422 = vmatprep.mubr.f32.mxu0 %v1248_v0  ;;  %552 = vmatprep.subr.mxu1 %v452_v1  ;;  %v636_v38 = vld [vmem:[#allocation8 + $0x78] sm:$0xff]  ;;  %v635_v40 = vld [vmem:[#allocation8 + $0x70] sm:$0xff]  ;;  %v650_v41 = vld [vmem:[#allocation8 + $0xe8] sm:$0xff]  ;;  %v342_v1 = vlaneseq }
  0x94   : > { %553 = vmatpush1.msra.mxu1 %v451_v2  ;;  %895 = vmatprep.subr.mxu0 %v652_v37  ;;  %v634_v42 = vld [vmem:[#allocation8 + $0x68] sm:$0xff]  ;;  %v649_v43 = vld [vmem:[#allocation8 + $0xe0] sm:$0xff]  ;;  %v648_v45 = vld [vmem:[#allocation8 + $0xd8] sm:$0xff] }
  0x95   : > { %554 = vmatprep.subr.mxu1 %v450_v3  ;;  %896 = vmatpush3.msra.mxu0 %v636_v38  ;;  %v633_v44 = vld [vmem:[#allocation8 + $0x60] sm:$0xff]  ;;  %v632_v46 = vld [vmem:[#allocation8 + $0x58] sm:$0xff]  ;;  %v647_v47 = vld [vmem:[#allocation8 + $0xd0] sm:$0xff]  ;;  %v343_v2 = vshrl.u32 %v342_v1, 7 }
  0x96   : > { %423 = vmatmul.mubr.f32.gmra.mxu0 %v1463_v58  ;;  %555 = vmatpush1.msra.mxu1 %v449_v4  ;;  %v631_v48 = vld [vmem:[#allocation8 + $0x50] sm:$0xff]  ;;  %v646_v49 = vld [vmem:[#allocation8 + $0xc8] sm:$0xff]  ;;  %v645_v51 = vld [vmem:[#allocation8 + $0xc0] sm:$0xff] }
  0x97   : > { %428 = vmatprep.mubr.f32.mxu0 %v1248_v0  ;;  %556 = vmatprep.subr.mxu1 %v512_v6  ;;  %v630_v50 = vld [vmem:[#allocation8 + $0x48] sm:$0xff]  ;;  %v629_v52 = vld [vmem:[#allocation8 + $0x40] sm:$0xff]  ;;  %v644_v54 = vld [vmem:[#allocation8 + $0xb8] sm:$0xff]  ;;  %v344_v3 = vsub.s32 0, %v343_v2  ;;  %v348_v6 = vsub.s32 1, %v343_v2 }
  0x98   : > { %557 = vmatpush2.msra.mxu1 %v511_v7  ;;  %897 = vmatprep.subr.mxu0 %v651_v39  ;;  %v628_v55 = vld [vmem:[#allocation8 + $0x38] sm:$0xff]  ;;  %v643_v56 = vld [vmem:[#allocation8 + $0xb0] sm:$0xff]  ;;  %v642_v59 = vld [vmem:[#allocation8 + $0xa8] sm:$0xff] }
  0x99   : > { %558 = vmatprep.subr.mxu1 %v510_v8  ;;  %898 = vmatpush3.msra.mxu0 %v635_v40  ;;  %v627_v57 = vld [vmem:[#allocation8 + $0x30] sm:$0xff]  ;;  %v626_v60 = vld [vmem:[#allocation8 + $0x28] sm:$0xff]  ;;  %v641_v61 = vld [vmem:[#allocation8 + $0xa0] sm:$0xff] }
  0x9a   : > { %429 = vmatmul.mubr.f32.gmra.mxu0 %v1468_v63  ;;  %559 = vmatpush2.msra.mxu1 %v509_v9  ;;  %v625_v62 = vld [vmem:[#allocation8 + $0x20] sm:$0xff]  ;;  %v622_v37 = vld [vmem:[#allocation8 + $0x8] sm:$0xff] }
  0x9b   : > { %434 = vmatprep.mubr.f32.mxu0 %v1248_v0  ;;  %560 = vmatprep.subr.mxu1 %v508_v10  ;;  %v505_v0 = vld [vmem:[#allocation7 + $0x1c0] sm:$0xff] }
  0x9c   : > { %561 = vmatpush2.msra.mxu1 %v507_v11  ;;  %899 = vmatprep.subr.mxu0 %v650_v41  ;;  %v305_v4 = vld [vmem:[#allocation10] ss:$8 sm:$0x3]  ;;  %v307_v40 = vld [vmem:[#allocation10 + $0x1] ss:$8 sm:$0x3] }
  0x9d   : > { %562 = vmatprep.subr.mxu1 %v506_v12  ;;  %900 = vmatpush3.msra.mxu0 %v634_v42  ;;  %v345_v7 = vrot.slane %v305_v4, %v344_v3  ;;  %v349_v8 = vrot.slane %v305_v4, %v348_v6  ;;  %v637_v38 = vld [vmem:[#allocation8 + $0x80] sm:$0xff]  ;;  %v517_v41 = vrot.slane %v307_v40, %v344_v3 }
  0x9e   : > { %435 = vmatmul.mubr.f32.gmra.mxu0 %v1473_v5  ;;  %563 = vmatpush2.msra.mxu1 %v505_v0  ;;  %v621_v39 = vld [vmem:[#allocation8] sm:$0xff]  ;;  %v521_v42 = vrot.slane %v307_v40, %v348_v6 }
  0x9f   : > { %564 = vmatprep.subr.mxu1 %v504_v13  ;;  %901 = vmatprep.subr.mxu0 %v649_v43 }
  0xa0   : > { %565 = vmatpush2.msra.mxu1 %v503_v14  ;;  %902 = vmatpush3.msra.mxu0 %v633_v44 }
  0xa1   : > { %566 = vmatprep.subr.mxu1 %v502_v15  ;;  %903 = vmatprep.subr.mxu0 %v648_v45 }
  0xa2   : > { %567 = vmatpush2.msra.mxu1 %v501_v16  ;;  %904 = vmatpush3.msra.mxu0 %v632_v46 }
  0xa3   : > { %568 = vmatprep.subr.mxu1 %v500_v17  ;;  %905 = vmatprep.subr.mxu0 %v647_v47 }
  0xa4   : > { %569 = vmatpush2.msra.mxu1 %v499_v18  ;;  %906 = vmatpush3.msra.mxu0 %v631_v48 }
  0xa5   : > { %570 = vmatprep.subr.mxu1 %v498_v19  ;;  %907 = vmatprep.subr.mxu0 %v646_v49 }
  0xa6   : > { %571 = vmatpush2.msra.mxu1 %v497_v20  ;;  %908 = vmatpush3.msra.mxu0 %v630_v50 }
  0xa7   : > { %572 = vmatprep.subr.mxu1 %v496_v21  ;;  %909 = vmatprep.subr.mxu0 %v645_v51 }
  0xa8   : > { %573 = vmatpush2.msra.mxu1 %v495_v22  ;;  %910 = vmatpush3.msra.mxu0 %v629_v52 }
  0xa9   : > { %574 = vmatprep.subr.mxu1 %v494_v23  ;;  %911 = vmatprep.subr.mxu0 %v644_v54 }
  0xaa   : > { %575 = vmatpush2.msra.mxu1 %v493_v24  ;;  %912 = vmatpush3.msra.mxu0 %v628_v55 }
  0xab   : > { %576 = vmatprep.subr.mxu1 %v492_v25  ;;  %913 = vmatprep.subr.mxu0 %v643_v56 }
  0xac   : > { %577 = vmatpush2.msra.mxu1 %v491_v26  ;;  %914 = vmatpush3.msra.mxu0 %v627_v57 }
  0xad   : > { %578 = vmatprep.subr.mxu1 %v490_v27  ;;  %915 = vmatprep.subr.mxu0 %v642_v59 }
  0xae   : > { %579 = vmatpush2.msra.mxu1 %v489_v28  ;;  %916 = vmatpush3.msra.mxu0 %v626_v60 }
  0xaf   : > { %580 = vmatprep.subr.mxu1 %v488_v29  ;;  %917 = vmatprep.subr.mxu0 %v641_v61 }
  0xb0   : > { %581 = vmatpush2.msra.mxu1 %v487_v30  ;;  %918 = vmatpush3.msra.mxu0 %v625_v62 }
  0xb1   : > { %582 = vmatprep.subr.mxu1 %v486_v31 }
  0xb2   : > { %583 = vmatpush2.msra.mxu1 %v485_v32  ;;  %v640_v32 = vld [vmem:[#allocation8 + $0x98] sm:$0xff] }
  0xb3   : > { %584 = vmatprep.subr.mxu1 %v484_v33  ;;  %919 = vmatprep.subr.mxu0 %v640_v32  ;;  %v624_v33 = vld [vmem:[#allocation8 + $0x18] sm:$0xff] }
  0xb4   : > { %585 = vmatpush2.msra.mxu1 %v483_v34  ;;  %920 = vmatpush3.msra.mxu0 %v624_v33  ;;  %v639_v34 = vld [vmem:[#allocation8 + $0x90] sm:$0xff] }
  0xb5   : > { %586 = vmatprep.subr.mxu1 %v482_v35  ;;  %921 = vmatprep.subr.mxu0 %v639_v34  ;;  %v623_v35 = vld [vmem:[#allocation8 + $0x10] sm:$0xff] }
  0xb6   : > { %587 = vmatpush2.msra.mxu1 %v481_v36  ;;  %922 = vmatpush3.msra.mxu0 %v623_v35  ;;  %v638_v36 = vld [vmem:[#allocation8 + $0x88] sm:$0xff] }
  0xb7   : > { %923 = vmatprep.subr.mxu0 %v638_v36 }
  0xb8   : > { %924 = vmatpush3.msra.mxu0 %v622_v37 }
  0xb9   : > { %925 = vmatprep.subr.mxu0 %v637_v38 }
  0xba   : > { %926 = vmatpush3.msra.mxu0 %v621_v39 }
 0x152   : > { %v418_v9 = vpop.f32.mrf.mxu0 }
 0x153   : > { %v419_v10 = vadd.f32 %v418_v9, %v345_v7  ;;  %v308_v9 = vld [vmem:[#allocation10 + $0x2] ss:$0 sm:$0xff] }
 0x154   : > { %v420_v11 = vpop.f32.mrf.mxu0 }
 0x155   : > { %v421_v12 = vadd.f32 %v420_v11, %v349_v8  ;;  %v441_v14 = vmax.f32 %v419_v10, 0.0 }
 0x156   : > { %v424_v0 = vpop.f32.mrf.mxu0 }
 0x157   : > { %v442_v13 = vmax.f32 %v421_v12, 0.0  ;;  %v425_v15 = vadd.f32 %v424_v0, %v345_v7 }
 0x158   : > { %v426_v16 = vpop.f32.mrf.mxu0 }
 0x159   : > { %v427_v17 = vadd.f32 %v426_v16, %v349_v8  ;;  %588 = vmatprep.mubr.f32.mxu1 %v442_v13  ;;  %v443_v20 = vmax.f32 %v425_v15, 0.0 }
 0x15a   : > { %v430_v18 = vpop.f32.mrf.mxu0  ;;  %589 = vmatmul.mubr.f32.vlgmr.msra.gmra.mxu1 %v441_v14 }
 0x15b   : > { %v444_v19 = vmax.f32 %v427_v17, 0.0  ;;  %v431_v21 = vadd.f32 %v430_v18, %v345_v7 }
 0x15c   : > { %v432_v22 = vpop.f32.mrf.mxu0 }
 0x15d   : > { %v433_v23 = vadd.f32 %v432_v22, %v349_v8  ;;  %594 = vmatprep.mubr.f32.mxu1 %v444_v19  ;;  %v445_v26 = vmax.f32 %v431_v21, 0.0 }
 0x15e   : > { %v436_v24 = vpop.f32.mrf.mxu0  ;;  %595 = vmatmul.mubr.f32.gmra.mxu1 %v443_v20 }
 0x15f   : > { %v446_v25 = vmax.f32 %v433_v23, 0.0  ;;  %v437_v27 = vadd.f32 %v436_v24, %v345_v7 }
 0x160   : > { %v438_v28 = vpop.f32.mrf.mxu0 }
 0x161   : > { %v439_v29 = vadd.f32 %v438_v28, %v349_v8  ;;  %600 = vmatprep.mubr.f32.mxu1 %v446_v25  ;;  %v447_v31 = vmax.f32 %v437_v27, 0.0 }
 0x162   : > { %601 = vmatmul.mubr.f32.gmra.mxu1 %v445_v26 }
 0x163   : > { %v448_v30 = vmax.f32 %v439_v29, 0.0 }
 0x165   : > { %606 = vmatprep.mubr.f32.mxu1 %v448_v30 }
 0x166   : > { %607 = vmatmul.mubr.f32.gmra.mxu1 %v447_v31 }
 0x21a   : > { %v590_v43 = vpop.f32.mrf.mxu1 }
 0x21b   : > { %v591_v44 = vadd.f32 %v590_v43, %v517_v41 }
 0x21c   : > { %v592_v45 = vpop.f32.mrf.mxu1 }
 0x21d   : > { %v593_v46 = vadd.f32 %v592_v45, %v521_v42  ;;  %v613_v49 = vmax.f32 %v591_v44, 0.0 }
 0x21e   : > { %v596_v47 = vpop.f32.mrf.mxu1 }
 0x21f   : > { %v614_v48 = vmax.f32 %v593_v46, 0.0  ;;  %v597_v50 = vadd.f32 %v596_v47, %v517_v41 }
 0x220   : > { %v598_v51 = vpop.f32.mrf.mxu1 }
 0x221   : > { %v599_v52 = vadd.f32 %v598_v51, %v521_v42  ;;  %717 = vmatprep.mubr.f32.mxu0 %v614_v48  ;;  %v615_v56 = vmax.f32 %v597_v50, 0.0 }
 0x222   : > { %v602_v54 = vpop.f32.mrf.mxu1  ;;  %718 = vmatmul.mubr.f32.vlgmr.msra.gmra.mxu0 %v613_v49 }
 0x223   : > { %v616_v55 = vmax.f32 %v599_v52, 0.0  ;;  %v603_v57 = vadd.f32 %v602_v54, %v517_v41 }
 0x224   : > { %v604_v59 = vpop.f32.mrf.mxu1 }
 0x225   : > { %v605_v60 = vadd.f32 %v604_v59, %v521_v42  ;;  %722 = vmatprep.mubr.f32.mxu0 %v616_v55  ;;  %v617_v1 = vmax.f32 %v603_v57, 0.0 }
 0x226   : > { %v608_v61 = vpop.f32.mrf.mxu1  ;;  %723 = vmatmul.mubr.f32.gmra.mxu0 %v615_v56 }
 0x227   : > { %v618_v62 = vmax.f32 %v605_v60, 0.0  ;;  %v609_v2 = vadd.f32 %v608_v61, %v517_v41 }
 0x228   : > { %v610_v3 = vpop.f32.mrf.mxu1 }
 0x229   : > { %v611_v4 = vadd.f32 %v610_v3, %v521_v42  ;;  %727 = vmatprep.mubr.f32.mxu0 %v618_v62  ;;  %v619_v7 = vmax.f32 %v609_v2, 0.0 }
 0x22a   : > { %728 = vmatmul.mubr.f32.gmra.mxu0 %v617_v1 }
 0x22b   : > { %v620_v6 = vmax.f32 %v611_v4, 0.0 }
 0x22d   : > { %732 = vmatprep.mubr.f32.mxu0 %v620_v6 }
 0x22e   : > { %733 = vmatmul.mubr.f32.gmra.mxu0 %v619_v7 }
 0x2e2   : > { %v927_v8 = vpop.f32.mrf.mxu0 }
 0x2e4   : > { %v928_v10 = vpop.f32.mrf.mxu0 }
 0x2e5   : > { %v929_v11 = vadd.f32 %v928_v10, %v927_v8 }
 0x2e6   : > { %v930_v12 = vpop.f32.mrf.mxu0 }
 0x2e7   : > { %v720_v0 = vadd.f32 %v929_v11, %v308_v9 }
 0x2e8   : > { %v931_v13 = vpop.f32.mrf.mxu0 }
 0x2e9   : > { %v738_v14 = vadd.f32 %v720_v0, %v1458_v53  ;;  %v932_v15 = vadd.f32 %v931_v13, %v930_v12 }
 0x2ea   : > { %v933_v16 = vpop.f32.mrf.mxu0 }
 0x2eb   : > { %742 = vst [vmem:[%s298_s24] sm:$0xff] %v738_v14  ;;  %v725_v17 = vadd.f32 %v932_v15, %v308_v9 }
 0x2ec   : > { %v934_v18 = vpop.f32.mrf.mxu0 }
 0x2ed   : > { %v739_v19 = vadd.f32 %v725_v17, %v1463_v58  ;;  %v935_v20 = vadd.f32 %v934_v18, %v933_v16 }
 0x2ee   : > { %v936_v21 = vpop.f32.mrf.mxu0 }
 0x2ef   : > { %743 = vst [vmem:[%s298_s24 + $0x8] sm:$0xff] %v739_v19  ;;  %v730_v22 = vadd.f32 %v935_v20, %v308_v9 }
 0x2f0   : > { %v937_v23 = vpop.f32.mrf.mxu0 }
 0x2f1   : > { %v740_v53 = vadd.f32 %v730_v22, %v1468_v63  ;;  %v938_v24 = vadd.f32 %v937_v23, %v936_v21 }
 0x2f3   : > { %744 = vst [vmem:[%s298_s24 + $0x10] sm:$0xff] %v740_v53  ;;  %v735_v25 = vadd.f32 %v938_v24, %v308_v9 }
 0x2f5   : > { %v741_v58 = vadd.f32 %v735_v25, %v1473_v5 }
 0x2f7   : > { %745 = vst [vmem:[%s298_s24 + $0x18] sm:$0xff] %v741_v58 }
 0x2f8   : > { %1178 = shalt.err (!%p1175_p5)
}
 0x2f9   : > { %s1179_s29 = scalar_lea.hbm %s1487_s12, 512  ;;  %s1183_s23 = scalar_lea.hbm %s1535_s5, 2048 }
 0x2fa   : > { %p1180_p6 = scmp.ne.s32.totalorder %s1487_s12, %s1179_s29  ;;  %p1184_p12 = scmp.lt.s32.totalorder %s1487_s12, %s1535_s5 }
 0x2fb   : > { %p1185_p10 = scmp.lt.s32.totalorder %s1183_s23, %s1179_s29 }
 0x2fc   : > { %p1181_p4 = pnand %p1180_p6, %p1555_p2 }
 0x2fd   : > { %p1186_p3 = por %p1185_p10, %p1184_p12 }
 0x2fe   : > { %p1182_p8 = pneg %p1181_p4 }
 0x300   : > { %p1187_p1 = pnand %p1186_p3, %p1182_p8 }
 0x302   : > { %1190 = shalt.err (!%p1187_p1)
}
 0x303   : > { %s1250_s14 = smov 128   ;;  %s1251_s6 = smov 8  }
 0x304   : > { %957 = dma.vmem_to_hbm [thread:$0]  (%p1555_p2), %s1482_s26, 512, %s1487_s12, %s747_s28, %s1250_s14, %s1250_s14, %s1251_s6  }
 0x305 PF: > { %p989_p11 = scmp.ge.s32.totalorder %s1237_s21, 2  ;;  %s775_s10 = sand.u32 1, %s1225_s18  }
 0x306   : > { %p1556_p7 = scmp.ne.s32.totalorder %s1542_s25, 0  ;;  %s776_s30 = scalar_lea.sflag [#allocation4], %s775_s10 }
 0x308   : > { %p977_p9 = pnand %p989_p11, %p1556_p7 }
 0x30a   : > { %p978_p13 = pneg %p977_p9 }
 0x30c   : > { %1220 = dma.done.wait (%p978_p13), %s776_s30, 512  }
 0x30d   : > { %1222 = vsyncadd (%p978_p13), %s776_s30, 4294966784  ;;  %p20_p0 = scmp.ge.s32.totalorder %s1378_s8, 6   ;;  %s1557_s18 = smov %s1229_s19 }
 0x30e   : > { %s1558_s19 = smov %s1233_s20  ;;  %s1559_s20 = smov %s1387_s15 }
 0x30f   : > { %s1560_s21 = smov %s1378_s8  ;;  %22 = sbr.rel (!%p20_p0) target bundleno = 7 (0x7), region = 102 }
 0x314   :  { %781 = vsyncpa [#allocation3], 1 }
 0x315   :  { %783 = vsyncpa [#allocation3 + $0x1], 1 }
 0x316   :  { %784 = vsyncpa [#allocation6], 1 }
 0x317   :  { %785 = vsyncpa [#allocation9], 1 }
 0x318   :  { %786 = vsyncpa [#allocation4], 1 }
 0x319   :  { %788 = vsyncpa [#allocation4 + $0x1], 1 }

// kernel: tpu_custom_call.1
= control target key start
LH: loop header
LB: loop body
LE: loop exit
PB: predicated region body
PF: predicated region fallthrough
CT: control target
= control target key end

     0   :  { %10 = vsyncpa [#allocation3], 0  ;;  %s1530_s0 = inlined_call_operand.hbm [shape: f32[128,128], index: 0, kind: input, shape index: {}]   ;;  %s1531_s1 = inlined_call_operand.hbm [shape: f32[128,256], index: 1, kind: input, shape index: {}]   ;;  %s1532_s2 = inlined_call_operand.hbm [shape: f32[256,256], index: 2, kind: input, shape index: {}]   ;;  %s1533_s3 = inlined_call_operand.hbm [shape: f32[256,128], index: 3, kind: input, shape index: {}]   ;;  %s1534_s4 = inlined_call_operand.hbm [shape: f32[8,256], index: 4, kind: input, shape index: {}]   ;;  %s1535_s5 = inlined_call_operand.hbm [shape: f32[128,128], index: 5, kind: output, shape index: {}]  }
   0x1   :  { %12 = vsyncpa [#allocation3 + $0x1], 0 }
   0x2   :  { %13 = vsyncpa [#allocation6], 0 }
   0x3   :  { %14 = vsyncpa [#allocation9], 0 }
   0x4   :  { %15 = vsyncpa [#allocation4], 0 }
   0x5   :  { %17 = vsyncpa [#allocation4 + $0x1], 0  ;;  %s1282_s18 = smov 0   ;;  %s1284_s19 = smov 0  }
   0x6   :  { %s1286_s20 = smov 0   ;;  %s1288_s21 = smov 0  }
   0x7 LB: > { %s1303_s22 = sadd.s32 4294967295, %s1237_s21   ;;  %s871_s23 = sadd.s32 4294967294, %s1237_s21   ;;  %s1237_s21 = sphi %s1288_s21, %s1560_s21   ;;  %s1233_s20 = sphi %s1286_s20, %s1559_s20   ;;  %s1229_s19 = sphi %s1284_s19, %s1558_s19   ;;  %s1225_s18 = sphi %s1282_s18, %s1557_s18  }
   0x8   : > { %p43_p0 = scmp.ne.s32.totalorder %s1229_s19, %s1225_s18  ;;  %p1536_p1 = scmp.eq.s32.totalorder %s1303_s22, 0 }
   0x9   : > { %p157_p3 = scmp.eq.s32.totalorder %s871_s23, 3  ;;  %p872_p5 = scmp.ge.s32.totalorder %s1237_s21, 1 }
   0xa   : > { %p1312_p4 = por %p1536_p1, %p43_p0  ;;  %p164_p7 = scmp.lt.s32.totalorder %s1237_s21, 5 }
   0xb   : > { %p1317_p6 = por %p157_p3, %p43_p0  ;;  %s1239_s27 = smov [#allocation5]  }
   0xc   : > { %s1541_s24 = scalar_select %p1312_p4, 1, 0 }
   0xd   : > { %s1542_s25 = scalar_select %p1317_p6, 1, 0 }
   0xe   : > { %p1322_p8 = pnand %p872_p5, %p164_p7  ;;  %s176_s28 = sshll.u32 %s1239_s27, 4  ;;  %s177_s28 = int_to_ptr.vmem [resolvable:$true] %s176_s28 }
   0xf   : > { %s1240_s30 = smov [#allocation8]   ;;  %s1044_s7 = scalar_lea.vmem %s177_s28, 4096 }
  0x10   : > { %s1543_s26 = scalar_select %p1322_p8, 1, 0 }
  0x11   : > { %p959_p9 = pneg %p1322_p8  ;;  %s202_s6 = sshll.u32 %s1240_s30, 4  ;;  %s203_s6 = int_to_ptr.vmem [resolvable:$true] %s202_s6 }
  0x12   : > { %p1045_p12 = scmp.ne.s32.totalorder %s177_s28, %s1044_s7  ;;  %p1052_p3 = scmp.lt.s32.totalorder %s177_s28, %s177_s28 }
  0x13   : > { %p1330_p10 = pnand %p959_p9, %p1536_p1  ;;  %p1053_p5 = scmp.lt.s32.totalorder %s1044_s7, %s1044_s7 }
  0x15   : > { %p1035_p11 = pneg %p1330_p10  ;;  %p1054_p7 = por %p1053_p5, %p1052_p3 }
  0x17   : > { %p1047_p13 = pnand %p1045_p12, %p1035_p11 }
  0x19   : > { %p1048_p0 = pneg %p1047_p13 }
  0x1b   : > { %p1055_p9 = pnand %p1054_p7, %p1048_p0 }
  0x1d   : > { %1058 = shalt.err (!%p1055_p9)
}
  0x1e   : > { %s1241_s8 = smov 256   ;;  %s1242_s9 = smov 16  }
  0x1f   : > { %962 = dma.hbm_to_vmem [thread:$0]  (!%p1330_p10), %s1531_s1, 4096, %s177_s28, [#allocation6], %s1241_s8, %s1241_s8, %s1242_s9  }
  0x20   : > { %s1070_s12 = scalar_lea.vmem %s203_s6, 4096  ;;  %p1078_p0 = scmp.lt.s32.totalorder %s203_s6, %s203_s6 }
  0x21   : > { %p1071_p12 = scmp.ne.s32.totalorder %s203_s6, %s1070_s12  ;;  %p1079_p5 = scmp.lt.s32.totalorder %s1070_s12, %s1070_s12 }
  0x23   : > { %p1073_p13 = pnand %p1071_p12, %p1035_p11  ;;  %p1080_p7 = por %p1079_p5, %p1078_p0 }
  0x25   : > { %p1074_p3 = pneg %p1073_p13 }
  0x27   : > { %p1081_p9 = pnand %p1080_p7, %p1074_p3 }
  0x29   : > { %1084 = shalt.err (!%p1081_p9)
}
  0x2a   : > { %s1537_s13 = smov 128   ;;  %s1244_s14 = smov 8  }
  0x2b   : > { %968 = dma.hbm_to_vmem [thread:$0]  (!%p1330_p10), %s1533_s3, 4096, %s203_s6, [#allocation9], %s1537_s13, %s1537_s13, %s1244_s14  }
  0x2c   : > { %s1245_s17 = smov [#allocation7]   ;;  %s1246_s27 = smov [#allocation10]  }
  0x2d   : > { %s189_s23 = sshll.u32 %s1245_s17, 4  ;;  %s216_s28 = sshll.u32 %s1246_s27, 4  ;;  %s190_s23 = int_to_ptr.vmem [resolvable:$true] %s189_s23  ;;  %s217_s28 = int_to_ptr.vmem [resolvable:$true] %s216_s28 }
  0x2e   : > { %s1096_s30 = scalar_lea.vmem %s190_s23, 8192  ;;  %p1104_p0 = scmp.lt.s32.totalorder %s190_s23, %s190_s23 }
  0x2f   : > { %p1097_p12 = scmp.ne.s32.totalorder %s190_s23, %s1096_s30  ;;  %p1105_p5 = scmp.lt.s32.totalorder %s1096_s30, %s1096_s30 }
  0x31   : > { %p1099_p13 = pnand %p1097_p12, %p1035_p11  ;;  %p1106_p7 = por %p1105_p5, %p1104_p0 }
  0x33   : > { %p1100_p3 = pneg %p1099_p13 }
  0x35   : > { %p1107_p9 = pnand %p1106_p7, %p1100_p3 }
  0x37   : > { %1110 = shalt.err (!%p1107_p9)
}
  0x38   : > { %965 = dma.hbm_to_vmem [thread:$0]  (!%p1330_p10), %s1532_s2, 8192, %s190_s23, [#allocation6], %s1241_s8, %s1241_s8, %s1242_s9  }
  0x39   : > { %s1122_s10 = scalar_lea.vmem %s217_s28, 256  ;;  %p1130_p2 = scmp.lt.s32.totalorder %s217_s28, %s217_s28 }
  0x3a   : > { %p1123_p1 = scmp.ne.s32.totalorder %s217_s28, %s1122_s10  ;;  %p1131_p0 = scmp.lt.s32.totalorder %s1122_s10, %s1122_s10 }
  0x3c   : > { %p1125_p12 = pnand %p1123_p1, %p1035_p11  ;;  %p1132_p3 = por %p1131_p0, %p1130_p2 }
  0x3e   : > { %p1126_p13 = pneg %p1125_p12 }
  0x40   : > { %p1133_p5 = pnand %p1132_p3, %p1126_p13 }
  0x42   : > { %1136 = shalt.err (!%p1133_p5)
}
  0x43   : > { %971 = dma.hbm_to_vmem [thread:$0]  (!%p1330_p10), %s1534_s4, 256, %s217_s28, [#allocation9]  }
  0x44   : > { %s1378_s8 = sadd.s32 1, %s1237_s21   ;;  %s30_s29 = sadd.s32 1, %s1233_s20 }
  0x45   : > { %s27_s9 = ssub.s32 %s1237_s21, %s1378_s8  ;;  %p37_p2 = scmp.ne.s32.totalorder %s1233_s20, %s1229_s19 }
  0x46   : > { %p28_p1 = scmp.eq.s32.totalorder %s27_s9, 0  ;;  %p38_p11 = scmp.eq.s32.totalorder %s1237_s21, 0 }
  0x47   : > { %p1545_p9 = scmp.eq.s32.totalorder %s1303_s22, 3  ;;  %p984_p13 = scmp.lt.s32.totalorder %s1237_s21, 4 }
  0x48   : > { %s1387_s15 = scalar_select %p28_p1, %s1233_s20, %s30_s29  }
  0x49   : > { %p39_p7 = por %p38_p11, %p37_p2  ;;  %p1391_p12 = por %p1545_p9, %p37_p2 }
  0x4a   : > { %s227_s17 = sand.u32 1, %s1233_s20   ;;  %s893_s27 = sshll.u32 %s1237_s21, 9 }
  0x4b   : > { %s1546_s16 = scalar_select %p1391_p12, 1, 0 }
  0x4c   : > { %s878_s23 = sshll.u32 %s227_s17, 5  ;;  %s1401_s6 = scalar_lea.hbm %s1530_s0, %s893_s27 }
  0x4d   : > { %s231_s7 = scalar_lea.vmem [#allocation2], %s878_s23  ;;  %p1405_p10 = pnand %p984_p13, %p39_p7 }
  0x4e   : > { %s238_s10 = sshll.u32 %s231_s7, 4  ;;  %s1409_s12 = scalar_lea.sflag [#allocation3], %s227_s17  ;;  %s1403_s10 = int_to_ptr.vmem [resolvable:$true] %s238_s10 }
  0x4f   : > { %s1137_s9 = scalar_lea.hbm %s1401_s6, 512  ;;  %p1139_p3 = pneg %p1405_p10 }
  0x50   : > { %p1138_p0 = scmp.ne.s32.totalorder %s1401_s6, %s1137_s9  ;;  %s1142_s23 = scalar_lea.hbm %s1530_s0, 2048 }
  0x51   : > { %p1143_p2 = scmp.lt.s32.totalorder %s1401_s6, %s1530_s0  ;;  %p1144_p11 = scmp.lt.s32.totalorder %s1142_s23, %s1137_s9 }
  0x52   : > { %p1140_p5 = pnand %p1139_p3, %p1138_p0 }
  0x53   : > { %p1145_p7 = por %p1144_p11, %p1143_p2 }
  0x54   : > { %p1141_p1 = pneg %p1140_p5 }
  0x56   : > { %p1146_p9 = pnand %p1145_p7, %p1141_p1 }
  0x58   : > { %1149 = shalt.err (!%p1146_p9)
}
  0x59   : > { %s1150_s17 = scalar_lea.vmem %s1403_s10, 512  ;;  %s1247_s7 = smov [#allocation2]  }
  0x5a   : > { %p1151_p13 = scmp.ne.s32.totalorder %s1403_s10, %s1150_s17  ;;  %s1155_s13 = sshll.u32 %s1247_s7, 4  ;;  %s1156_s13 = int_to_ptr.vmem [resolvable:$false] %s1155_s13 }
  0x5b   : > { %s1157_s29 = scalar_lea.vmem %s1156_s13, 1024  ;;  %p1158_p5 = scmp.lt.s32.totalorder %s1403_s10, %s1156_s13 }
  0x5c   : > { %p1153_p6 = pnand %p1151_p13, %p1139_p3  ;;  %p1159_p12 = scmp.lt.s32.totalorder %s1157_s29, %s1150_s17 }
  0x5e   : > { %p1154_p0 = pneg %p1153_p6  ;;  %p1160_p4 = por %p1159_p12, %p1158_p5 }
  0x60   : > { %p1161_p8 = pnand %p1160_p4, %p1154_p0 }
  0x62   : > { %1164 = shalt.err (!%p1161_p8)
}
  0x63   : > { %s1548_s9 = smov 128   ;;  %p1549_p6 = scmp.ne.s32.totalorder %s1543_s26, 0 }
  0x64   : > { %975 = dma.hbm_to_vmem [thread:$0]  (!%p1405_p10), %s1401_s6, 512, %s1403_s10, %s1409_s12, %s1548_s9, %s1548_s9, %s1244_s14  }
  0x65   : > { %250 = sbr.rel (%p1549_p6) target bundleno = 773 (0x305), region = 40  ;;  %s1436_s27 = sand.u32 (!%p1549_p6), 1, %s1229_s19  }
  0x66   : > { %s882_s13 = sshll.u32 (!%p1549_p6), %s1436_s27, 5  ;;  %s253_s23 = scalar_lea.sflag (!%p1549_p6), [#allocation3], %s1436_s27 }
  0x67   : > { %s1442_s11 = scalar_lea.vmem (!%p1549_p6), [#allocation2], %s882_s13  ;;  %p1550_p4 = scmp.ne.s32.totalorder (!%p1549_p6), %s1541_s24, 0 }
  0x6a   : > { %1208 = dma.done.wait (%p1550_p4), %s253_s23, 512  }
  0x6b   : > { %1210 = vsyncadd (%p1550_p4), %s253_s23, 4294966784  ;;  %p1551_p8 = scmp.eq.s32.totalorder %s1303_s22, 0 }
  0x6d   : > { %1212 = dma.done.wait (%p1551_p8), [#allocation6], 12288   ;;  %p1552_p12 = pmov %p1551_p8 }
  0x6e   : > { %p1553_p10 = pmov %p1551_p8 }
  0x6f   : > { %1214 = vsyncadd (%p1552_p12), [#allocation6], 4294955008 }
  0x70   : > { %1216 = dma.done.wait (%p1553_p10), [#allocation9], 4352   ;;  %p1554_p3 = pmov %p1551_p8 }
  0x71   : > { %v1248_v0 = vmov 0.0   ;;  %v340_v1 = vld [vmem:[#allocation5 + $0xf8] sm:$0xff]  ;;  %v339_v2 = vld [vmem:[#allocation5 + $0xf0] sm:$0xff]  ;;  %v338_v3 = vld [vmem:[#allocation5 + $0xe8] sm:$0xff]  ;;  %s298_s24 = scalar_lea.vmem [#allocation11], %s882_s13  ;;  %s894_s14 = sshll.u32 %s1303_s22, 9 }
  0x72   : > { %1218 = vsyncadd (%p1554_p3), [#allocation9], 4294962944  ;;  %416 = vmatprep.mubr.f32.mxu0 %v1248_v0  ;;  %352 = vmatprep.subr.mxu0 %v340_v1  ;;  %v337_v4 = vld [vmem:[#allocation5 + $0xe0] sm:$0xff]  ;;  %v336_v5 = vld [vmem:[#allocation5 + $0xd8] sm:$0xff]  ;;  %s760_s26 = sshll.u32 %s298_s24, 4  ;;  %s1487_s12 = scalar_lea.hbm %s1535_s5, %s894_s14  ;;  %s1482_s26 = int_to_ptr.vmem [resolvable:$true] %s760_s26 }
  0x73   : > { %353 = vmatpush1.msra.mxu0 %v339_v2  ;;  %v335_v6 = vld [vmem:[#allocation5 + $0xd0] sm:$0xff]  ;;  %v334_v7 = vld [vmem:[#allocation5 + $0xc8] sm:$0xff]  ;;  %v333_v8 = vld [vmem:[#allocation5 + $0xc0] sm:$0xff]  ;;  %s747_s28 = scalar_lea.sflag [#allocation4], %s1436_s27  ;;  %s1165_s30 = scalar_lea.vmem %s1482_s26, 512 }
  0x74   : > { %354 = vmatprep.subr.mxu0 %v338_v3  ;;  %v332_v9 = vld [vmem:[#allocation5 + $0xb8] sm:$0xff]  ;;  %v331_v10 = vld [vmem:[#allocation5 + $0xb0] sm:$0xff]  ;;  %v330_v11 = vld [vmem:[#allocation5 + $0xa8] sm:$0xff]  ;;  %p1166_p1 = scmp.ne.s32.totalorder %s1482_s26, %s1165_s30  ;;  %p1555_p2 = scmp.ne.s32.totalorder %s1546_s16, 0 }
  0x75   : > { %355 = vmatpush1.msra.mxu0 %v337_v4  ;;  %v329_v12 = vld [vmem:[#allocation5 + $0xa0] sm:$0xff]  ;;  %v328_v13 = vld [vmem:[#allocation5 + $0x98] sm:$0xff]  ;;  %v327_v14 = vld [vmem:[#allocation5 + $0x90] sm:$0xff]  ;;  %s1249_s22 = smov [#allocation11]  }
  0x76   : > { %356 = vmatprep.subr.mxu0 %v336_v5  ;;  %v326_v15 = vld [vmem:[#allocation5 + $0x88] sm:$0xff]  ;;  %v480_v16 = vld [vmem:[#allocation7 + $0xf8] sm:$0xff]  ;;  %v479_v17 = vld [vmem:[#allocation7 + $0xf0] sm:$0xff]  ;;  %p1167_p11 = pnand %p1166_p1, %p1555_p2  ;;  %s1169_s17 = sshll.u32 %s1249_s22, 4  ;;  %s1170_s17 = int_to_ptr.vmem [resolvable:$false] %s1169_s17 }
  0x77   : > { %357 = vmatpush1.msra.mxu0 %v335_v6  ;;  %v478_v18 = vld [vmem:[#allocation7 + $0xe8] sm:$0xff]  ;;  %v325_v19 = vld [vmem:[#allocation5 + $0x80] sm:$0xff]  ;;  %524 = vmatprep.subr.mxu1 %v480_v16  ;;  %v324_v21 = vld [vmem:[#allocation5 + $0x78] sm:$0xff]  ;;  %s1171_s7 = scalar_lea.vmem %s1170_s17, 1024  ;;  %p1172_p9 = scmp.lt.s32.totalorder %s1482_s26, %s1170_s17 }
  0x78   : > { %358 = vmatprep.subr.mxu0 %v334_v7  ;;  %v477_v20 = vld [vmem:[#allocation7 + $0xe0] sm:$0xff]  ;;  %525 = vmatpush1.msra.mxu1 %v479_v17  ;;  %v476_v22 = vld [vmem:[#allocation7 + $0xd8] sm:$0xff]  ;;  %v323_v23 = vld [vmem:[#allocation5 + $0x70] sm:$0xff]  ;;  %p1168_p7 = pneg %p1167_p11  ;;  %p1173_p13 = scmp.lt.s32.totalorder %s1171_s7, %s1165_s30 }
  0x79   : > { %359 = vmatpush1.msra.mxu0 %v333_v8  ;;  %526 = vmatprep.subr.mxu1 %v478_v18  ;;  %v475_v24 = vld [vmem:[#allocation7 + $0xd0] sm:$0xff]  ;;  %v322_v25 = vld [vmem:[#allocation5 + $0x68] sm:$0xff]  ;;  %v321_v27 = vld [vmem:[#allocation5 + $0x60] sm:$0xff] }
  0x7a   : > { %360 = vmatprep.subr.mxu0 %v332_v9  ;;  %527 = vmatpush1.msra.mxu1 %v477_v20  ;;  %v474_v26 = vld [vmem:[#allocation7 + $0xc8] sm:$0xff]  ;;  %v473_v28 = vld [vmem:[#allocation7 + $0xc0] sm:$0xff]  ;;  %v320_v29 = vld [vmem:[#allocation5 + $0x58] sm:$0xff]  ;;  %p1174_p0 = por %p1173_p13, %p1172_p9 }
  0x7b   : > { %361 = vmatpush1.msra.mxu0 %v331_v10  ;;  %528 = vmatprep.subr.mxu1 %v476_v22  ;;  %v472_v30 = vld [vmem:[#allocation7 + $0xb8] sm:$0xff]  ;;  %v319_v31 = vld [vmem:[#allocation5 + $0x50] sm:$0xff]  ;;  %v318_v33 = vld [vmem:[#allocation5 + $0x48] sm:$0xff] }
  0x7c   : > { %362 = vmatprep.subr.mxu0 %v330_v11  ;;  %529 = vmatpush1.msra.mxu1 %v475_v24  ;;  %v471_v32 = vld [vmem:[#allocation7 + $0xb0] sm:$0xff]  ;;  %v470_v34 = vld [vmem:[#allocation7 + $0xa8] sm:$0xff]  ;;  %v317_v35 = vld [vmem:[#allocation5 + $0x40] sm:$0xff]  ;;  %p1175_p5 = pnand %p1174_p0, %p1168_p7 }
  0x7d   : > { %363 = vmatpush1.msra.mxu0 %v329_v12  ;;  %530 = vmatprep.subr.mxu1 %v474_v26  ;;  %v469_v36 = vld [vmem:[#allocation7 + $0xa0] sm:$0xff]  ;;  %v316_v37 = vld [vmem:[#allocation5 + $0x38] sm:$0xff]  ;;  %v315_v39 = vld [vmem:[#allocation5 + $0x30] sm:$0xff] }
  0x7e   : > { %364 = vmatprep.subr.mxu0 %v328_v13  ;;  %531 = vmatpush1.msra.mxu1 %v473_v28  ;;  %v468_v38 = vld [vmem:[#allocation7 + $0x98] sm:$0xff]  ;;  %v467_v40 = vld [vmem:[#allocation7 + $0x90] sm:$0xff]  ;;  %v314_v41 = vld [vmem:[#allocation5 + $0x28] sm:$0xff] }
  0x7f   : > { %365 = vmatpush1.msra.mxu0 %v327_v14  ;;  %532 = vmatprep.subr.mxu1 %v472_v30  ;;  %v466_v42 = vld [vmem:[#allocation7 + $0x88] sm:$0xff]  ;;  %v313_v43 = vld [vmem:[#allocation5 + $0x20] sm:$0xff]  ;;  %v312_v45 = vld [vmem:[#allocation5 + $0x18] sm:$0xff] }
  0x80   : > { %366 = vmatprep.subr.mxu0 %v326_v15  ;;  %533 = vmatpush1.msra.mxu1 %v471_v32  ;;  %v465_v44 = vld [vmem:[#allocation7 + $0x80] sm:$0xff]  ;;  %v464_v46 = vld [vmem:[#allocation7 + $0x78] sm:$0xff]  ;;  %v311_v47 = vld [vmem:[#allocation5 + $0x10] sm:$0xff] }
  0x81   : > { %367 = vmatpush1.msra.mxu0 %v325_v19  ;;  %534 = vmatprep.subr.mxu1 %v470_v34  ;;  %v463_v48 = vld [vmem:[#allocation7 + $0x70] sm:$0xff]  ;;  %v310_v49 = vld [vmem:[#allocation5 + $0x8] sm:$0xff]  ;;  %v309_v51 = vld [vmem:[#allocation5] sm:$0xff] }
  0x82   : > { %368 = vmatprep.subr.mxu0 %v324_v21  ;;  %535 = vmatpush1.msra.mxu1 %v469_v36  ;;  %v462_v50 = vld [vmem:[#allocation7 + $0x68] sm:$0xff]  ;;  %v461_v52 = vld [vmem:[#allocation7 + $0x60] sm:$0xff]  ;;  %v460_v54 = vld [vmem:[#allocation7 + $0x58] sm:$0xff] }
  0x83   : > { %369 = vmatpush1.msra.mxu0 %v323_v23  ;;  %536 = vmatprep.subr.mxu1 %v468_v38  ;;  %v1458_v53 = vld [vmem:[%s1442_s11] sm:$0xff]  ;;  %v459_v55 = vld [vmem:[#allocation7 + $0x50] sm:$0xff]  ;;  %v458_v56 = vld [vmem:[#allocation7 + $0x48] sm:$0xff] }
  0x84   : > { %370 = vmatprep.subr.mxu0 %v322_v25  ;;  %537 = vmatpush1.msra.mxu1 %v467_v40  ;;  %v457_v57 = vld [vmem:[#allocation7 + $0x40] sm:$0xff]  ;;  %v1463_v58 = vld [vmem:[%s1442_s11 + $0x8] sm:$0xff]  ;;  %v456_v59 = vld [vmem:[#allocation7 + $0x38] sm:$0xff] }
  0x85   : > { %371 = vmatpush1.msra.mxu0 %v321_v27  ;;  %538 = vmatprep.subr.mxu1 %v466_v42  ;;  %v455_v60 = vld [vmem:[#allocation7 + $0x30] sm:$0xff]  ;;  %v454_v61 = vld [vmem:[#allocation7 + $0x28] sm:$0xff]  ;;  %v453_v62 = vld [vmem:[#allocation7 + $0x20] sm:$0xff] }
  0x86   : > { %372 = vmatprep.subr.mxu0 %v320_v29  ;;  %539 = vmatpush1.msra.mxu1 %v465_v44  ;;  %v1468_v63 = vld [vmem:[%s1442_s11 + $0x10] sm:$0xff]  ;;  %v452_v1 = vld [vmem:[#allocation7 + $0x18] sm:$0xff]  ;;  %v450_v3 = vld [vmem:[#allocation7 + $0x8] sm:$0xff] }
  0x87   : > { %373 = vmatpush1.msra.mxu0 %v319_v31  ;;  %540 = vmatprep.subr.mxu1 %v464_v46  ;;  %v451_v2 = vld [vmem:[#allocation7 + $0x10] sm:$0xff]  ;;  %v449_v4 = vld [vmem:[#allocation7] sm:$0xff]  ;;  %v1473_v5 = vld [vmem:[%s1442_s11 + $0x18] sm:$0xff] }
  0x88   : > { %374 = vmatprep.subr.mxu0 %v318_v33  ;;  %541 = vmatpush1.msra.mxu1 %v463_v48  ;;  %v512_v6 = vld [vmem:[#allocation7 + $0x1f8] sm:$0xff]  ;;  %v511_v7 = vld [vmem:[#allocation7 + $0x1f0] sm:$0xff]  ;;  %v510_v8 = vld [vmem:[#allocation7 + $0x1e8] sm:$0xff] }
  0x89   : > { %375 = vmatpush1.msra.mxu0 %v317_v35  ;;  %542 = vmatprep.subr.mxu1 %v462_v50  ;;  %v509_v9 = vld [vmem:[#allocation7 + $0x1e0] sm:$0xff]  ;;  %v508_v10 = vld [vmem:[#allocation7 + $0x1d8] sm:$0xff]  ;;  %v507_v11 = vld [vmem:[#allocation7 + $0x1d0] sm:$0xff] }
  0x8a   : > { %376 = vmatprep.subr.mxu0 %v316_v37  ;;  %543 = vmatpush1.msra.mxu1 %v461_v52  ;;  %v506_v12 = vld [vmem:[#allocation7 + $0x1c8] sm:$0xff]  ;;  %v504_v13 = vld [vmem:[#allocation7 + $0x1b8] sm:$0xff]  ;;  %v503_v14 = vld [vmem:[#allocation7 + $0x1b0] sm:$0xff] }
  0x8b   : > { %377 = vmatpush1.msra.mxu0 %v315_v39  ;;  %544 = vmatprep.subr.mxu1 %v460_v54  ;;  %v502_v15 = vld [vmem:[#allocation7 + $0x1a8] sm:$0xff]  ;;  %v501_v16 = vld [vmem:[#allocation7 + $0x1a0] sm:$0xff]  ;;  %v500_v17 = vld [vmem:[#allocation7 + $0x198] sm:$0xff] }
  0x8c   : > { %378 = vmatprep.subr.mxu0 %v314_v41  ;;  %545 = vmatpush1.msra.mxu1 %v459_v55  ;;  %v499_v18 = vld [vmem:[#allocation7 + $0x190] sm:$0xff]  ;;  %v498_v19 = vld [vmem:[#allocation7 + $0x188] sm:$0xff]  ;;  %v497_v20 = vld [vmem:[#allocation7 + $0x180] sm:$0xff] }
  0x8d   : > { %379 = vmatpush1.msra.mxu0 %v313_v43  ;;  %546 = vmatprep.subr.mxu1 %v458_v56  ;;  %v496_v21 = vld [vmem:[#allocation7 + $0x178] sm:$0xff]  ;;  %v495_v22 = vld [vmem:[#allocation7 + $0x170] sm:$0xff]  ;;  %v494_v23 = vld [vmem:[#allocation7 + $0x168] sm:$0xff] }
  0x8e   : > { %380 = vmatprep.subr.mxu0 %v312_v45  ;;  %547 = vmatpush1.msra.mxu1 %v457_v57  ;;  %v493_v24 = vld [vmem:[#allocation7 + $0x160] sm:$0xff]  ;;  %v492_v25 = vld [vmem:[#allocation7 + $0x158] sm:$0xff]  ;;  %v491_v26 = vld [vmem:[#allocation7 + $0x150] sm:$0xff] }
  0x8f   : > { %381 = vmatpush1.msra.mxu0 %v311_v47  ;;  %548 = vmatprep.subr.mxu1 %v456_v59  ;;  %v490_v27 = vld [vmem:[#allocation7 + $0x148] sm:$0xff]  ;;  %v489_v28 = vld [vmem:[#allocation7 + $0x140] sm:$0xff]  ;;  %v488_v29 = vld [vmem:[#allocation7 + $0x138] sm:$0xff] }
  0x90   : > { %382 = vmatprep.subr.mxu0 %v310_v49  ;;  %549 = vmatpush1.msra.mxu1 %v455_v60  ;;  %v487_v30 = vld [vmem:[#allocation7 + $0x130] sm:$0xff]  ;;  %v486_v31 = vld [vmem:[#allocation7 + $0x128] sm:$0xff]  ;;  %v485_v32 = vld [vmem:[#allocation7 + $0x120] sm:$0xff] }
  0x91   : > { %383 = vmatpush1.msra.mxu0 %v309_v51  ;;  %550 = vmatprep.subr.mxu1 %v454_v61  ;;  %v484_v33 = vld [vmem:[#allocation7 + $0x118] sm:$0xff]  ;;  %v483_v34 = vld [vmem:[#allocation7 + $0x110] sm:$0xff]  ;;  %v482_v35 = vld [vmem:[#allocation7 + $0x108] sm:$0xff] }
  0x92   : > { %417 = vmatmul.mubr.f32.vlgmr.msra.gmra.mxu0 %v1458_v53  ;;  %551 = vmatpush1.msra.mxu1 %v453_v62  ;;  %v481_v36 = vld [vmem:[#allocation7 + $0x100] sm:$0xff]  ;;  %v652_v37 = vld [vmem:[#allocation8 + $0xf8] sm:$0xff]  ;;  %v651_v39 = vld [vmem:[#allocation8 + $0xf0] sm:$0xff] }
  0x93   : > { %422 = vmatprep.mubr.f32.mxu0 %v1248_v0  ;;  %552 = vmatprep.subr.mxu1 %v452_v1  ;;  %v636_v38 = vld [vmem:[#allocation8 + $0x78] sm:$0xff]  ;;  %v635_v40 = vld [vmem:[#allocation8 + $0x70] sm:$0xff]  ;;  %v650_v41 = vld [vmem:[#allocation8 + $0xe8] sm:$0xff]  ;;  %v342_v1 = vlaneseq }
  0x94   : > { %553 = vmatpush1.msra.mxu1 %v451_v2  ;;  %895 = vmatprep.subr.mxu0 %v652_v37  ;;  %v634_v42 = vld [vmem:[#allocation8 + $0x68] sm:$0xff]  ;;  %v649_v43 = vld [vmem:[#allocation8 + $0xe0] sm:$0xff]  ;;  %v648_v45 = vld [vmem:[#allocation8 + $0xd8] sm:$0xff] }
  0x95   : > { %554 = vmatprep.subr.mxu1 %v450_v3  ;;  %896 = vmatpush3.msra.mxu0 %v636_v38  ;;  %v633_v44 = vld [vmem:[#allocation8 + $0x60] sm:$0xff]  ;;  %v632_v46 = vld [vmem:[#allocation8 + $0x58] sm:$0xff]  ;;  %v647_v47 = vld [vmem:[#allocation8 + $0xd0] sm:$0xff]  ;;  %v343_v2 = vshrl.u32 %v342_v1, 7 }
  0x96   : > { %423 = vmatmul.mubr.f32.gmra.mxu0 %v1463_v58  ;;  %555 = vmatpush1.msra.mxu1 %v449_v4  ;;  %v631_v48 = vld [vmem:[#allocation8 + $0x50] sm:$0xff]  ;;  %v646_v49 = vld [vmem:[#allocation8 + $0xc8] sm:$0xff]  ;;  %v645_v51 = vld [vmem:[#allocation8 + $0xc0] sm:$0xff] }
  0x97   : > { %428 = vmatprep.mubr.f32.mxu0 %v1248_v0  ;;  %556 = vmatprep.subr.mxu1 %v512_v6  ;;  %v630_v50 = vld [vmem:[#allocation8 + $0x48] sm:$0xff]  ;;  %v629_v52 = vld [vmem:[#allocation8 + $0x40] sm:$0xff]  ;;  %v644_v54 = vld [vmem:[#allocation8 + $0xb8] sm:$0xff]  ;;  %v344_v3 = vsub.s32 0, %v343_v2  ;;  %v348_v6 = vsub.s32 1, %v343_v2 }
  0x98   : > { %557 = vmatpush2.msra.mxu1 %v511_v7  ;;  %897 = vmatprep.subr.mxu0 %v651_v39  ;;  %v628_v55 = vld [vmem:[#allocation8 + $0x38] sm:$0xff]  ;;  %v643_v56 = vld [vmem:[#allocation8 + $0xb0] sm:$0xff]  ;;  %v642_v59 = vld [vmem:[#allocation8 + $0xa8] sm:$0xff] }
  0x99   : > { %558 = vmatprep.subr.mxu1 %v510_v8  ;;  %898 = vmatpush3.msra.mxu0 %v635_v40  ;;  %v627_v57 = vld [vmem:[#allocation8 + $0x30] sm:$0xff]  ;;  %v626_v60 = vld [vmem:[#allocation8 + $0x28] sm:$0xff]  ;;  %v641_v61 = vld [vmem:[#allocation8 + $0xa0] sm:$0xff] }
  0x9a   : > { %429 = vmatmul.mubr.f32.gmra.mxu0 %v1468_v63  ;;  %559 = vmatpush2.msra.mxu1 %v509_v9  ;;  %v625_v62 = vld [vmem:[#allocation8 + $0x20] sm:$0xff]  ;;  %v622_v37 = vld [vmem:[#allocation8 + $0x8] sm:$0xff] }
  0x9b   : > { %434 = vmatprep.mubr.f32.mxu0 %v1248_v0  ;;  %560 = vmatprep.subr.mxu1 %v508_v10  ;;  %v505_v0 = vld [vmem:[#allocation7 + $0x1c0] sm:$0xff] }
  0x9c   : > { %561 = vmatpush2.msra.mxu1 %v507_v11  ;;  %899 = vmatprep.subr.mxu0 %v650_v41  ;;  %v305_v4 = vld [vmem:[#allocation10] ss:$8 sm:$0x3]  ;;  %v307_v40 = vld [vmem:[#allocation10 + $0x1] ss:$8 sm:$0x3] }
  0x9d   : > { %562 = vmatprep.subr.mxu1 %v506_v12  ;;  %900 = vmatpush3.msra.mxu0 %v634_v42  ;;  %v345_v7 = vrot.slane %v305_v4, %v344_v3  ;;  %v349_v8 = vrot.slane %v305_v4, %v348_v6  ;;  %v637_v38 = vld [vmem:[#allocation8 + $0x80] sm:$0xff]  ;;  %v517_v41 = vrot.slane %v307_v40, %v344_v3 }
  0x9e   : > { %435 = vmatmul.mubr.f32.gmra.mxu0 %v1473_v5  ;;  %563 = vmatpush2.msra.mxu1 %v505_v0  ;;  %v621_v39 = vld [vmem:[#allocation8] sm:$0xff]  ;;  %v521_v42 = vrot.slane %v307_v40, %v348_v6 }
  0x9f   : > { %564 = vmatprep.subr.mxu1 %v504_v13  ;;  %901 = vmatprep.subr.mxu0 %v649_v43 }
  0xa0   : > { %565 = vmatpush2.msra.mxu1 %v503_v14  ;;  %902 = vmatpush3.msra.mxu0 %v633_v44 }
  0xa1   : > { %566 = vmatprep.subr.mxu1 %v502_v15  ;;  %903 = vmatprep.subr.mxu0 %v648_v45 }
  0xa2   : > { %567 = vmatpush2.msra.mxu1 %v501_v16  ;;  %904 = vmatpush3.msra.mxu0 %v632_v46 }
  0xa3   : > { %568 = vmatprep.subr.mxu1 %v500_v17  ;;  %905 = vmatprep.subr.mxu0 %v647_v47 }
  0xa4   : > { %569 = vmatpush2.msra.mxu1 %v499_v18  ;;  %906 = vmatpush3.msra.mxu0 %v631_v48 }
  0xa5   : > { %570 = vmatprep.subr.mxu1 %v498_v19  ;;  %907 = vmatprep.subr.mxu0 %v646_v49 }
  0xa6   : > { %571 = vmatpush2.msra.mxu1 %v497_v20  ;;  %908 = vmatpush3.msra.mxu0 %v630_v50 }
  0xa7   : > { %572 = vmatprep.subr.mxu1 %v496_v21  ;;  %909 = vmatprep.subr.mxu0 %v645_v51 }
  0xa8   : > { %573 = vmatpush2.msra.mxu1 %v495_v22  ;;  %910 = vmatpush3.msra.mxu0 %v629_v52 }
  0xa9   : > { %574 = vmatprep.subr.mxu1 %v494_v23  ;;  %911 = vmatprep.subr.mxu0 %v644_v54 }
  0xaa   : > { %575 = vmatpush2.msra.mxu1 %v493_v24  ;;  %912 = vmatpush3.msra.mxu0 %v628_v55 }
  0xab   : > { %576 = vmatprep.subr.mxu1 %v492_v25  ;;  %913 = vmatprep.subr.mxu0 %v643_v56 }
  0xac   : > { %577 = vmatpush2.msra.mxu1 %v491_v26  ;;  %914 = vmatpush3.msra.mxu0 %v627_v57 }
  0xad   : > { %578 = vmatprep.subr.mxu1 %v490_v27  ;;  %915 = vmatprep.subr.mxu0 %v642_v59 }
  0xae   : > { %579 = vmatpush2.msra.mxu1 %v489_v28  ;;  %916 = vmatpush3.msra.mxu0 %v626_v60 }
  0xaf   : > { %580 = vmatprep.subr.mxu1 %v488_v29  ;;  %917 = vmatprep.subr.mxu0 %v641_v61 }
  0xb0   : > { %581 = vmatpush2.msra.mxu1 %v487_v30  ;;  %918 = vmatpush3.msra.mxu0 %v625_v62 }
  0xb1   : > { %582 = vmatprep.subr.mxu1 %v486_v31 }
  0xb2   : > { %583 = vmatpush2.msra.mxu1 %v485_v32  ;;  %v640_v32 = vld [vmem:[#allocation8 + $0x98] sm:$0xff] }
  0xb3   : > { %584 = vmatprep.subr.mxu1 %v484_v33  ;;  %919 = vmatprep.subr.mxu0 %v640_v32  ;;  %v624_v33 = vld [vmem:[#allocation8 + $0x18] sm:$0xff] }
  0xb4   : > { %585 = vmatpush2.msra.mxu1 %v483_v34  ;;  %920 = vmatpush3.msra.mxu0 %v624_v33  ;;  %v639_v34 = vld [vmem:[#allocation8 + $0x90] sm:$0xff] }
  0xb5   : > { %586 = vmatprep.subr.mxu1 %v482_v35  ;;  %921 = vmatprep.subr.mxu0 %v639_v34  ;;  %v623_v35 = vld [vmem:[#allocation8 + $0x10] sm:$0xff] }
  0xb6   : > { %587 = vmatpush2.msra.mxu1 %v481_v36  ;;  %922 = vmatpush3.msra.mxu0 %v623_v35  ;;  %v638_v36 = vld [vmem:[#allocation8 + $0x88] sm:$0xff] }
  0xb7   : > { %923 = vmatprep.subr.mxu0 %v638_v36 }
  0xb8   : > { %924 = vmatpush3.msra.mxu0 %v622_v37 }
  0xb9   : > { %925 = vmatprep.subr.mxu0 %v637_v38 }
  0xba   : > { %926 = vmatpush3.msra.mxu0 %v621_v39 }
 0x152   : > { %v418_v9 = vpop.f32.mrf.mxu0 }
 0x153   : > { %v419_v10 = vadd.f32 %v418_v9, %v345_v7  ;;  %v308_v9 = vld [vmem:[#allocation10 + $0x2] ss:$0 sm:$0xff] }
 0x154   : > { %v420_v11 = vpop.f32.mrf.mxu0 }
 0x155   : > { %v421_v12 = vadd.f32 %v420_v11, %v349_v8  ;;  %v441_v14 = vmax.f32 %v419_v10, 0.0 }
 0x156   : > { %v424_v0 = vpop.f32.mrf.mxu0 }
 0x157   : > { %v442_v13 = vmax.f32 %v421_v12, 0.0  ;;  %v425_v15 = vadd.f32 %v424_v0, %v345_v7 }
 0x158   : > { %v426_v16 = vpop.f32.mrf.mxu0 }
 0x159   : > { %v427_v17 = vadd.f32 %v426_v16, %v349_v8  ;;  %588 = vmatprep.mubr.f32.mxu1 %v442_v13  ;;  %v443_v20 = vmax.f32 %v425_v15, 0.0 }
 0x15a   : > { %v430_v18 = vpop.f32.mrf.mxu0  ;;  %589 = vmatmul.mubr.f32.vlgmr.msra.gmra.mxu1 %v441_v14 }
 0x15b   : > { %v444_v19 = vmax.f32 %v427_v17, 0.0  ;;  %v431_v21 = vadd.f32 %v430_v18, %v345_v7 }
 0x15c   : > { %v432_v22 = vpop.f32.mrf.mxu0 }
 0x15d   : > { %v433_v23 = vadd.f32 %v432_v22, %v349_v8  ;;  %594 = vmatprep.mubr.f32.mxu1 %v444_v19  ;;  %v445_v26 = vmax.f32 %v431_v21, 0.0 }
 0x15e   : > { %v436_v24 = vpop.f32.mrf.mxu0  ;;  %595 = vmatmul.mubr.f32.gmra.mxu1 %v443_v20 }
 0x15f   : > { %v446_v25 = vmax.f32 %v433_v23, 0.0  ;;  %v437_v27 = vadd.f32 %v436_v24, %v345_v7 }
 0x160   : > { %v438_v28 = vpop.f32.mrf.mxu0 }
 0x161   : > { %v439_v29 = vadd.f32 %v438_v28, %v349_v8  ;;  %600 = vmatprep.mubr.f32.mxu1 %v446_v25  ;;  %v447_v31 = vmax.f32 %v437_v27, 0.0 }
 0x162   : > { %601 = vmatmul.mubr.f32.gmra.mxu1 %v445_v26 }
 0x163   : > { %v448_v30 = vmax.f32 %v439_v29, 0.0 }
 0x165   : > { %606 = vmatprep.mubr.f32.mxu1 %v448_v30 }
 0x166   : > { %607 = vmatmul.mubr.f32.gmra.mxu1 %v447_v31 }
 0x21a   : > { %v590_v43 = vpop.f32.mrf.mxu1 }
 0x21b   : > { %v591_v44 = vadd.f32 %v590_v43, %v517_v41 }
 0x21c   : > { %v592_v45 = vpop.f32.mrf.mxu1 }
 0x21d   : > { %v593_v46 = vadd.f32 %v592_v45, %v521_v42  ;;  %v613_v49 = vmax.f32 %v591_v44, 0.0 }
 0x21e   : > { %v596_v47 = vpop.f32.mrf.mxu1 }
 0x21f   : > { %v614_v48 = vmax.f32 %v593_v46, 0.0  ;;  %v597_v50 = vadd.f32 %v596_v47, %v517_v41 }
 0x220   : > { %v598_v51 = vpop.f32.mrf.mxu1 }
 0x221   : > { %v599_v52 = vadd.f32 %v598_v51, %v521_v42  ;;  %717 = vmatprep.mubr.f32.mxu0 %v614_v48  ;;  %v615_v56 = vmax.f32 %v597_v50, 0.0 }
 0x222   : > { %v602_v54 = vpop.f32.mrf.mxu1  ;;  %718 = vmatmul.mubr.f32.vlgmr.msra.gmra.mxu0 %v613_v49 }
 0x223   : > { %v616_v55 = vmax.f32 %v599_v52, 0.0  ;;  %v603_v57 = vadd.f32 %v602_v54, %v517_v41 }
 0x224   : > { %v604_v59 = vpop.f32.mrf.mxu1 }
 0x225   : > { %v605_v60 = vadd.f32 %v604_v59, %v521_v42  ;;  %722 = vmatprep.mubr.f32.mxu0 %v616_v55  ;;  %v617_v1 = vmax.f32 %v603_v57, 0.0 }
 0x226   : > { %v608_v61 = vpop.f32.mrf.mxu1  ;;  %723 = vmatmul.mubr.f32.gmra.mxu0 %v615_v56 }
 0x227   : > { %v618_v62 = vmax.f32 %v605_v60, 0.0  ;;  %v609_v2 = vadd.f32 %v608_v61, %v517_v41 }
 0x228   : > { %v610_v3 = vpop.f32.mrf.mxu1 }
 0x229   : > { %v611_v4 = vadd.f32 %v610_v3, %v521_v42  ;;  %727 = vmatprep.mubr.f32.mxu0 %v618_v62  ;;  %v619_v7 = vmax.f32 %v609_v2, 0.0 }
 0x22a   : > { %728 = vmatmul.mubr.f32.gmra.mxu0 %v617_v1 }
 0x22b   : > { %v620_v6 = vmax.f32 %v611_v4, 0.0 }
 0x22d   : > { %732 = vmatprep.mubr.f32.mxu0 %v620_v6 }
 0x22e   : > { %733 = vmatmul.mubr.f32.gmra.mxu0 %v619_v7 }
 0x2e2   : > { %v927_v8 = vpop.f32.mrf.mxu0 }
 0x2e4   : > { %v928_v10 = vpop.f32.mrf.mxu0 }
 0x2e5   : > { %v929_v11 = vadd.f32 %v928_v10, %v927_v8 }
 0x2e6   : > { %v930_v12 = vpop.f32.mrf.mxu0 }
 0x2e7   : > { %v720_v0 = vadd.f32 %v929_v11, %v308_v9 }
 0x2e8   : > { %v931_v13 = vpop.f32.mrf.mxu0 }
 0x2e9   : > { %v738_v14 = vadd.f32 %v720_v0, %v1458_v53  ;;  %v932_v15 = vadd.f32 %v931_v13, %v930_v12 }
 0x2ea   : > { %v933_v16 = vpop.f32.mrf.mxu0 }
 0x2eb   : > { %742 = vst [vmem:[%s298_s24] sm:$0xff] %v738_v14  ;;  %v725_v17 = vadd.f32 %v932_v15, %v308_v9 }
 0x2ec   : > { %v934_v18 = vpop.f32.mrf.mxu0 }
 0x2ed   : > { %v739_v19 = vadd.f32 %v725_v17, %v1463_v58  ;;  %v935_v20 = vadd.f32 %v934_v18, %v933_v16 }
 0x2ee   : > { %v936_v21 = vpop.f32.mrf.mxu0 }
 0x2ef   : > { %743 = vst [vmem:[%s298_s24 + $0x8] sm:$0xff] %v739_v19  ;;  %v730_v22 = vadd.f32 %v935_v20, %v308_v9 }
 0x2f0   : > { %v937_v23 = vpop.f32.mrf.mxu0 }
 0x2f1   : > { %v740_v53 = vadd.f32 %v730_v22, %v1468_v63  ;;  %v938_v24 = vadd.f32 %v937_v23, %v936_v21 }
 0x2f3   : > { %744 = vst [vmem:[%s298_s24 + $0x10] sm:$0xff] %v740_v53  ;;  %v735_v25 = vadd.f32 %v938_v24, %v308_v9 }
 0x2f5   : > { %v741_v58 = vadd.f32 %v735_v25, %v1473_v5 }
 0x2f7   : > { %745 = vst [vmem:[%s298_s24 + $0x18] sm:$0xff] %v741_v58 }
 0x2f8   : > { %1178 = shalt.err (!%p1175_p5)
}
 0x2f9   : > { %s1179_s29 = scalar_lea.hbm %s1487_s12, 512  ;;  %s1183_s23 = scalar_lea.hbm %s1535_s5, 2048 }
 0x2fa   : > { %p1180_p6 = scmp.ne.s32.totalorder %s1487_s12, %s1179_s29  ;;  %p1184_p12 = scmp.lt.s32.totalorder %s1487_s12, %s1535_s5 }
 0x2fb   : > { %p1185_p10 = scmp.lt.s32.totalorder %s1183_s23, %s1179_s29 }
 0x2fc   : > { %p1181_p4 = pnand %p1180_p6, %p1555_p2 }
 0x2fd   : > { %p1186_p3 = por %p1185_p10, %p1184_p12 }
 0x2fe   : > { %p1182_p8 = pneg %p1181_p4 }
 0x300   : > { %p1187_p1 = pnand %p1186_p3, %p1182_p8 }
 0x302   : > { %1190 = shalt.err (!%p1187_p1)
}
 0x303   : > { %s1250_s14 = smov 128   ;;  %s1251_s6 = smov 8  }
 0x304   : > { %957 = dma.vmem_to_hbm [thread:$0]  (%p1555_p2), %s1482_s26, 512, %s1487_s12, %s747_s28, %s1250_s14, %s1250_s14, %s1251_s6  }
 0x305 PF: > { %p989_p11 = scmp.ge.s32.totalorder %s1237_s21, 2  ;;  %s775_s10 = sand.u32 1, %s1225_s18  }
 0x306   : > { %p1556_p7 = scmp.ne.s32.totalorder %s1542_s25, 0  ;;  %s776_s30 = scalar_lea.sflag [#allocation4], %s775_s10 }
 0x308   : > { %p977_p9 = pnand %p989_p11, %p1556_p7 }
 0x30a   : > { %p978_p13 = pneg %p977_p9 }
 0x30c   : > { %1220 = dma.done.wait (%p978_p13), %s776_s30, 512  }
 0x30d   : > { %1222 = vsyncadd (%p978_p13), %s776_s30, 4294966784  ;;  %p20_p0 = scmp.ge.s32.totalorder %s1378_s8, 6   ;;  %s1557_s18 = smov %s1229_s19 }
 0x30e   : > { %s1558_s19 = smov %s1233_s20  ;;  %s1559_s20 = smov %s1387_s15 }
 0x30f   : > { %s1560_s21 = smov %s1378_s8  ;;  %22 = sbr.rel (!%p20_p0) target bundleno = 7 (0x7), region = 102 }
 0x314   :  { %781 = vsyncpa [#allocation3], 1 }
 0x315   :  { %783 = vsyncpa [#allocation3 + $0x1], 1 }
 0x316   :  { %784 = vsyncpa [#allocation6], 1 }
 0x317   :  { %785 = vsyncpa [#allocation9], 1 }
 0x318   :  { %786 = vsyncpa [#allocation4], 1 }
 0x319   :  { %788 = vsyncpa [#allocation4 + $0x1], 1 }

</bundles_post_ra>
